<compile_context>
chip_gen: v7x
topology: tpu7x:2x2x1
jax: 0.10.0
libtpu: 0.0.40
codegen_flags: <defaults>
</compile_context>

<pallas_src>
import functools

import jax
import jax.numpy as jnp
from jax.experimental import pallas as pl
from jax.experimental.pallas import tpu as pltpu


def _supcon_kernel(lhs_ref, rhs_ref, lab_row_ref, lab_col_ref, bias_ref,
                   invcnt_ref, o_ref, m_sc, l_sc, ps_sc, *, n_valid):
    """One (tq, tk) logits strip; online softmax over the contrast axis."""
    tq = lhs_ref.shape[0]
    tk = rhs_ref.shape[1]
    i = pl.program_id(0)          # row (anchor) tile
    k = pl.program_id(1)          # column (contrast) tile == reduction axis

    @pl.when(k == 0)
    def _():
        m_sc[...] = jnp.full_like(m_sc, -jnp.inf)
        l_sc[...] = jnp.zeros_like(l_sc)
        ps_sc[...] = jnp.zeros_like(ps_sc)

    # (tq, tk) similarity strip, already scaled by 1/tau (folded into lhs).
    s = jnp.dot(lhs_ref[...], rhs_ref[...], preferred_element_type=jnp.float32)

    # Self-contrast exclusion: global col == global row <=> (r - c) == k*tk - i*tq.
    row_l = jax.lax.broadcasted_iota(jnp.int32, (tq, tk), 0)
    col_l = jax.lax.broadcasted_iota(jnp.int32, (tq, tk), 1)
    not_self = (row_l - col_l) != (k * tk - i * tq)

    # Denominator logits: padded columns masked by the additive bias row,
    # the diagonal by the where.  (Tile 0 always holds >=1 valid column, so the
    # running max is finite from the first step and masked exps underflow to 0.)
    sb = jnp.where(not_self, s + bias_ref[...], jnp.float32(-1e30))

    # Online softmax (denominator) update.
    m_prev = m_sc[...]
    m_new = jnp.maximum(m_prev, jnp.max(sb, axis=1, keepdims=True))
    alpha = jnp.exp(m_prev - m_new)
    p = jnp.exp(sb - m_new)
    l_sc[...] = alpha * l_sc[...] + jnp.sum(p, axis=1, keepdims=True)
    m_sc[...] = m_new

    # Positive-pair logit sum (padded columns carry a sentinel label -> no match).
    pos = (lab_row_ref[...] == lab_col_ref[...]) & not_self
    ps_sc[...] += jnp.sum(jnp.where(pos, s, jnp.float32(0.0)), axis=1, keepdims=True)

    @pl.when(k == pl.num_programs(1) - 1)
    def _():
        row_idx = jax.lax.broadcasted_iota(jnp.int32, (tq, 1), 0) + i * tq
        # loss_r = logsumexp(denom) - mean(positives); invcnt is the exact 1/count.
        loss = m_sc[...] + jnp.log(l_sc[...]) - ps_sc[...] * invcnt_ref[...]
        o_ref[...] = jnp.where(row_idx < n_valid, loss, jnp.float32(0.0))


def _round_up(x, m):
    return ((x + m - 1) // m) * m


def supcon_loss(z1, z2, labels=None, tau=1.0, tile=256):
    """SupConLoss.forward.  labels=None degenerates to SimCLR (eye mask)."""
    z1 = jnp.asarray(z1, jnp.float32)
    z2 = jnp.asarray(z2, jnp.float32)
    b, d = z1.shape
    n = 2 * b

    # ---- wrapper-side prep (hoisted out of the kernel) ----------------------
    cf = jnp.concatenate([z1, z2], axis=0)                        # (2B, D)
    nrm = jnp.sqrt(jnp.sum(cf * cf, axis=1, keepdims=True))
    cf_n = cf / jnp.maximum(nrm, jnp.float32(1e-12))              # F.normalize

    d_pad = _round_up(d, 128)
    n_pad0 = _round_up(n, 128)
    tq = min(int(tile), n_pad0)
    tk = tq                                                       # square strip tiles
    n_pad = _round_up(n_pad0, tq)

    cf_p = jnp.zeros((n_pad, d_pad), jnp.float32).at[:n, :d].set(cf_n)
    lhs = (cf_p * jnp.float32(1.0 / tau)).astype(jnp.bfloat16)    # (N, D), /tau folded
    rhs = cf_p.astype(jnp.bfloat16).T                             # (D, N), MXU-natural

    # Duplicated labels; padded slots hold an int32 sentinel that never matches.
    if labels is None:
        lab = jnp.arange(b, dtype=jnp.int32)                      # eye-mask case
    else:
        lab = jnp.asarray(labels, jnp.int32).reshape(-1)
    sentinel = jnp.iinfo(jnp.int32).min
    lab2 = jnp.concatenate([lab, lab], axis=0)                    # (2B,)
    lab_p = jnp.full((n_pad,), sentinel, jnp.int32).at[:n].set(lab2)
    lab_row = lab_p.reshape(n_pad, 1)
    lab_col = lab_p.reshape(1, n_pad)

    # Additive padding bias for the softmax denominator (0 valid / -1e30 pad).
    col_valid = jnp.arange(n_pad) < n
    bias = jnp.where(col_valid, 0.0, -1e30).astype(jnp.float32).reshape(1, n_pad)

    # Exact per-anchor positive counts: 2 * count(label in batch) - 1.
    if labels is None:
        cnt = jnp.ones((b,), jnp.float32)
    else:
        cnt = jnp.sum((lab[:, None] == lab[None, :]).astype(jnp.float32), axis=1)
    inv_cnt = 1.0 / (2.0 * cnt - 1.0)
    inv_cnt2 = jnp.concatenate([inv_cnt, inv_cnt], axis=0)
    inv_cnt_p = jnp.ones((n_pad,), jnp.float32).at[:n].set(inv_cnt2).reshape(n_pad, 1)

    grid = (n_pad // tq, n_pad // tk)

    flops = 2 * n_pad * n_pad * d_pad
    transcendentals = n_pad * n_pad
    bytes_accessed = (n_pad * d_pad * 2                 # lhs (streamed once)
                      + grid[0] * n_pad * d_pad * 2     # rhs re-streamed per row tile
                      + 6 * n_pad * 4)                  # labels / bias / counts / out

    vmem_limit = int(2 * 2 * (tq * d_pad + d_pad * tk) * 2   # double-buffered bf16 tiles
                     + 12 * tq * tk * 4                      # live (tq, tk) f32 temps
                     + (8 << 20))                            # small blocks + headroom
    vmem_limit = max(32 << 20, min(vmem_limit, 64 << 20))

    row_loss = pl.pallas_call(
        functools.partial(_supcon_kernel, n_valid=n),
        out_shape=jax.ShapeDtypeStruct((n_pad, 1), jnp.float32),
        grid_spec=pltpu.PrefetchScalarGridSpec(
            num_scalar_prefetch=0,
            grid=grid,
            in_specs=[
                pl.BlockSpec((tq, d_pad), lambda i, k: (i, 0)),   # lhs anchor tile
                pl.BlockSpec((d_pad, tk), lambda i, k: (0, k)),   # rhs contrast tile
                pl.BlockSpec((tq, 1), lambda i, k: (i, 0)),       # anchor labels
                pl.BlockSpec((1, tk), lambda i, k: (0, k)),       # contrast labels
                pl.BlockSpec((1, tk), lambda i, k: (0, k)),       # padding bias row
                pl.BlockSpec((tq, 1), lambda i, k: (i, 0)),       # 1 / positive count
            ],
            out_specs=pl.BlockSpec((tq, 1), lambda i, k: (i, 0)),
            scratch_shapes=[pltpu.VMEM((tq, 1), jnp.float32)] * 3,  # m, l, pos_sum
        ),
        compiler_params=pltpu.CompilerParams(
            dimension_semantics=("parallel", "arbitrary"),
            vmem_limit_bytes=vmem_limit,
        ),
        cost_estimate=pl.CostEstimate(
            flops=flops, transcendentals=transcendentals,
            bytes_accessed=bytes_accessed),
    )(lhs, rhs, lab_row, lab_col, bias, inv_cnt_p)

    # TODO(synk): a lane-dense / per-tile partial-sum output would avoid the masked
    # (tq,1) stores; kept as a tiny JAX reduction (padded rows already zeroed).
    return jnp.sum(row_loss) / jnp.float32(n)


def _supcon_loss_ref(z1, z2, labels=None, tau=1.0):
    """Pure-JAX f32 reference (mirrors the PyTorch module) for verification."""
    def normalize(x):
        nrm = jnp.maximum(jnp.linalg.norm(x, axis=1, keepdims=True), 1e-12)
        return x / nrm

    z1, z2 = normalize(z1), normalize(z2)
    b = z1.shape[0]
    if labels is None:
        mask = jnp.eye(b, dtype=jnp.float32)
    else:
        labels = jnp.asarray(labels).reshape(-1, 1)
        mask = (labels == labels.T).astype(jnp.float32)
    cf = jnp.concatenate([z1, z2], axis=0)
    adc = (cf @ cf.T) / tau
    logits = adc - jnp.max(adc, axis=1, keepdims=True)
    mask = jnp.tile(mask, (2, 2))
    logits_mask = 1.0 - jnp.eye(2 * b, dtype=jnp.float32)
    mask = mask * logits_mask
    exp_logits = jnp.exp(logits) * logits_mask
    log_prob = logits - jnp.log(jnp.sum(exp_logits, axis=1, keepdims=True))
    mean_log_prob_pos = jnp.sum(mask * log_prob, axis=1) / jnp.sum(mask, axis=1)
    return jnp.mean(-mean_log_prob_pos)


if __name__ == "__main__":
    B, D = 8, 32
    key = jax.random.PRNGKey(0)
    k1, k2 = jax.random.split(key)
    z1 = jax.random.normal(k1, (B, D), dtype=jnp.float32)
    z2 = jax.random.normal(k2, (B, D), dtype=jnp.float32)
    labels = jnp.array([0, 1, 0, 1, 2, 2, 3, 3], dtype=jnp.int32)

    # bf16 MXU operands -> compare at 2e-2 tolerances against the f32 reference.
    def check(got, want):
        got = jax.block_until_ready(got)
        assert jnp.allclose(got, want, rtol=2e-2, atol=2e-2), (got, want)

    # SupCon case (with labels)
    check(supcon_loss(z1, z2, labels, tau=1.0), _supcon_loss_ref(z1, z2, labels, tau=1.0))

    # SimCLR degenerate case (labels=None)
    check(supcon_loss(z1, z2, None, tau=1.0), _supcon_loss_ref(z1, z2, None, tau=1.0))

    # Non-unit temperature (exercises the wrapper-side 1/tau fold)
    check(supcon_loss(z1, z2, labels, tau=0.5), _supcon_loss_ref(z1, z2, labels, tau=0.5))

    # Multi-tile case: exercises the online-softmax accumulation across column
    # tiles, padded columns in the last tile, and padded/zeroed rows.
    B2 = 72
    k3, k4 = jax.random.split(jax.random.PRNGKey(1))
    z1b = jax.random.normal(k3, (B2, D), dtype=jnp.float32)
    z2b = jax.random.normal(k4, (B2, D), dtype=jnp.float32)
    labels_b = jnp.arange(B2, dtype=jnp.int32) % 9
    check(supcon_loss(z1b, z2b, labels_b, tau=0.5, tile=128),
          _supcon_loss_ref(z1b, z2b, labels_b, tau=0.5))

    print("KERNEL_OK")
</pallas_src>

<mosaic_0001>
module attributes {stable_mosaic.version = 11 : i64} {
  func.func @_supcon_kernel(%arg0: i32, %arg1: i32, %arg2: memref<128x128xbf16, #tpu.memory_space<vmem>>, %arg3: memref<128x128xbf16, #tpu.memory_space<vmem>>, %arg4: memref<128x1xi32, #tpu.memory_space<vmem>>, %arg5: memref<1x128xi32, #tpu.memory_space<vmem>>, %arg6: memref<1x128xf32, #tpu.memory_space<vmem>>, %arg7: memref<128x1xf32, #tpu.memory_space<vmem>>, %arg8: memref<128x1xf32, #tpu.memory_space<vmem>>, %arg9: memref<128x1xf32, #tpu.memory_space<vmem>>, %arg10: memref<128x1xf32, #tpu.memory_space<vmem>>, %arg11: memref<128x1xf32, #tpu.memory_space<vmem>>) attributes {dimension_semantics = [#tpu.dimension_semantics<parallel>, #tpu.dimension_semantics<arbitrary>], iteration_bounds = array<i64: 1, 1>, scalar_prefetch = 0 : i64, scratch_operands = 3 : i64, tpu.core_type = #tpu.core_type<tc>, window_params = [{transform_indices = @transform_0, window_bounds = array<i64: 128, 128>}, {transform_indices = @transform_1, window_bounds = array<i64: 128, 128>}, {transform_indices = @transform_2, window_bounds = array<i64: 128, 1>}, {transform_indices = @transform_3, window_bounds = array<i64: 1, 128>}, {transform_indices = @transform_4, window_bounds = array<i64: 1, 128>}, {transform_indices = @transform_5, window_bounds = array<i64: 128, 1>}, {transform_indices = @transform_6, window_bounds = array<i64: 128, 1>}]} {
    %c0_i32 = arith.constant 0 : i32
    %0 = arith.cmpi eq, %arg1, %c0_i32 : i32
    %1 = arith.extui %0 : i1 to i32
    %c0_i32_0 = arith.constant 0 : i32
    %2 = arith.cmpi ne, %1, %c0_i32_0 : i32
    scf.if %2 {
      %cst_30 = arith.constant 0xFF800000 : f32
      %51 = vector.broadcast %cst_30 : f32 to vector<128x1xf32>
      %c0_31 = arith.constant 0 : index
      %c0_32 = arith.constant 0 : index
      %52 = vector.load %arg9[%c0_31, %c0_32] : memref<128x1xf32, #tpu.memory_space<vmem>>, vector<128x1xf32>
      tpu.vector_store %arg9[%c0_31, %c0_32], %51 {strides = array<i32>} : memref<128x1xf32, #tpu.memory_space<vmem>>, vector<128x1xf32>,
      %cst_33 = arith.constant 0.000000e+00 : f32
      %53 = vector.broadcast %cst_33 : f32 to vector<128x1xf32>
      %c0_34 = arith.constant 0 : index
      %c0_35 = arith.constant 0 : index
      %54 = vector.load %arg10[%c0_34, %c0_35] : memref<128x1xf32, #tpu.memory_space<vmem>>, vector<128x1xf32>
      tpu.vector_store %arg10[%c0_34, %c0_35], %53 {strides = array<i32>} : memref<128x1xf32, #tpu.memory_space<vmem>>, vector<128x1xf32>,
      %cst_36 = arith.constant 0.000000e+00 : f32
      %55 = vector.broadcast %cst_36 : f32 to vector<128x1xf32>
      %c0_37 = arith.constant 0 : index
      %c0_38 = arith.constant 0 : index
      %56 = vector.load %arg11[%c0_37, %c0_38] : memref<128x1xf32, #tpu.memory_space<vmem>>, vector<128x1xf32>
      tpu.vector_store %arg11[%c0_37, %c0_38], %55 {strides = array<i32>} : memref<128x1xf32, #tpu.memory_space<vmem>>, vector<128x1xf32>,
    } else {
    }
    %c0 = arith.constant 0 : index
    %c0_1 = arith.constant 0 : index
    %3 = vector.load %arg2[%c0, %c0_1] : memref<128x128xbf16, #tpu.memory_space<vmem>>, vector<128x128xbf16>
    %c0_2 = arith.constant 0 : index
    %c0_3 = arith.constant 0 : index
    %4 = vector.load %arg3[%c0_2, %c0_3] : memref<128x128xbf16, #tpu.memory_space<vmem>>, vector<128x128xbf16>
    %cst = arith.constant dense<0.000000e+00> : vector<128x128xf32>
    %5 = tpu.matmul %3, %4, %cst {dimension_numbers = #tpu.dot_dimension_numbers<[1], [0], [0], [1], [0, 0, 1, 1], [], []>} : vector<128x128xbf16>, vector<128x128xbf16>, vector<128x128xf32> -> vector<128x128xf32>
    %6 = tpu.iota {dimensions = array<i32: 0>} : vector<128x128xi32>
    %7 = tpu.iota {dimensions = array<i32: 1>} : vector<128x128xi32>
    %8 = arith.subi %6, %7 : vector<128x128xi32>
    %c128_i32 = arith.constant 128 : i32
    %9 = arith.muli %arg1, %c128_i32 : i32
    %c128_i32_4 = arith.constant 128 : i32
    %10 = arith.muli %arg0, %c128_i32_4 : i32
    %11 = arith.subi %9, %10 : i32
    %12 = vector.broadcast %11 : i32 to vector<128x128xi32>
    %13 = arith.cmpi ne, %8, %12 : vector<128x128xi32>
    %c0_5 = arith.constant 0 : index
    %c0_6 = arith.constant 0 : index
    %14 = vector.load %arg6[%c0_5, %c0_6] : memref<1x128xf32, #tpu.memory_space<vmem>>, vector<1x128xf32>
    %15 = vector.broadcast %14 : vector<1x128xf32> to vector<128x128xf32>
    %16 = arith.addf %5, %15 : vector<128x128xf32>
    %cst_7 = arith.constant -1.000000e+30 : f32
    %17 = vector.broadcast %cst_7 : f32 to vector<128x128xf32>
    %18 = arith.select %13, %16, %17 : vector<128x128xi1>, vector<128x128xf32>
    %c0_8 = arith.constant 0 : index
    %c0_9 = arith.constant 0 : index
    %19 = vector.load %arg9[%c0_8, %c0_9] : memref<128x1xf32, #tpu.memory_space<vmem>>, vector<128x1xf32>
    %cst_10 = arith.constant dense<0xFF800000> : vector<128xf32>
    %20 = vector.multi_reduction <maximumf>, %18, %cst_10 [1] : vector<128x128xf32> to vector<128xf32>
    %21 = vector.shape_cast %20 : vector<128xf32> to vector<128x1xf32>
    %22 = arith.maximumf %19, %21 : vector<128x1xf32>
    %23 = arith.subf %19, %22 : vector<128x1xf32>
    %24 = math.exp %23 : vector<128x1xf32>
    %25 = vector.broadcast %22 : vector<128x1xf32> to vector<128x128xf32>
    %26 = arith.subf %18, %25 : vector<128x128xf32>
    %27 = math.exp %26 : vector<128x128xf32>
    %c0_11 = arith.constant 0 : index
    %c0_12 = arith.constant 0 : index
    %28 = vector.load %arg10[%c0_11, %c0_12] : memref<128x1xf32, #tpu.memory_space<vmem>>, vector<128x1xf32>
    %29 = arith.mulf %24, %28 : vector<128x1xf32>
    %cst_13 = arith.constant dense<0.000000e+00> : vector<128xf32>
    %30 = vector.multi_reduction <add>, %27, %cst_13 [1] : vector<128x128xf32> to vector<128xf32>
    %31 = vector.shape_cast %30 : vector<128xf32> to vector<128x1xf32>
    %32 = arith.addf %29, %31 : vector<128x1xf32>
    %c0_14 = arith.constant 0 : index
    %c0_15 = arith.constant 0 : index
    %33 = vector.load %arg10[%c0_14, %c0_15] : memref<128x1xf32, #tpu.memory_space<vmem>>, vector<128x1xf32>
    tpu.vector_store %arg10[%c0_14, %c0_15], %32 {strides = array<i32>} : memref<128x1xf32, #tpu.memory_space<vmem>>, vector<128x1xf32>,
    %c0_16 = arith.constant 0 : index
    %c0_17 = arith.constant 0 : index
    %34 = vector.load %arg9[%c0_16, %c0_17] : memref<128x1xf32, #tpu.memory_space<vmem>>, vector<128x1xf32>
    tpu.vector_store %arg9[%c0_16, %c0_17], %22 {strides = array<i32>} : memref<128x1xf32, #tpu.memory_space<vmem>>, vector<128x1xf32>,
    %c0_18 = arith.constant 0 : index
    %c0_19 = arith.constant 0 : index
    %35 = vector.load %arg4[%c0_18, %c0_19] : memref<128x1xi32, #tpu.memory_space<vmem>>, vector<128x1xi32>
    %c0_20 = arith.constant 0 : index
    %c0_21 = arith.constant 0 : index
    %36 = vector.load %arg5[%c0_20, %c0_21] : memref<1x128xi32, #tpu.memory_space<vmem>>, vector<1x128xi32>
    %37 = vector.broadcast %35 : vector<128x1xi32> to vector<128x128xi32>
    %38 = vector.broadcast %36 : vector<1x128xi32> to vector<128x128xi32>
    %39 = arith.cmpi eq, %37, %38 : vector<128x128xi32>
    %40 = arith.andi %39, %13 : vector<128x128xi1>
    %c0_22 = arith.constant 0 : index
    %c0_23 = arith.constant 0 : index
    %41 = vector.load %arg11[%c0_22, %c0_23] : memref<128x1xf32, #tpu.memory_space<vmem>>, vector<128x1xf32>
    %cst_24 = arith.constant 0.000000e+00 : f32
    %42 = vector.broadcast %cst_24 : f32 to vector<128x128xf32>
    %43 = arith.select %40, %5, %42 : vector<128x128xi1>, vector<128x128xf32>
    %cst_25 = arith.constant dense<0.000000e+00> : vector<128xf32>
    %44 = vector.multi_reduction <add>, %43, %cst_25 [1] : vector<128x128xf32> to vector<128xf32>
    %45 = vector.shape_cast %44 : vector<128xf32> to vector<128x1xf32>
    %46 = arith.addf %41, %45 : vector<128x1xf32>
    %c0_26 = arith.constant 0 : index
    %c0_27 = arith.constant 0 : index
    %47 = vector.load %arg11[%c0_26, %c0_27] : memref<128x1xf32, #tpu.memory_space<vmem>>, vector<128x1xf32>
    tpu.vector_store %arg11[%c0_26, %c0_27], %46 {strides = array<i32>} : memref<128x1xf32, #tpu.memory_space<vmem>>, vector<128x1xf32>,
    %c0_i32_28 = arith.constant 0 : i32
    %48 = arith.cmpi eq, %arg1, %c0_i32_28 : i32
    %49 = arith.extui %48 : i1 to i32
    %c0_i32_29 = arith.constant 0 : i32
    %50 = arith.cmpi ne, %49, %c0_i32_29 : i32
    scf.if %50 {
      %51 = tpu.iota {dimensions = array<i32: 0>} : vector<128x1xi32>
      %c128_i32_30 = arith.constant 128 : i32
      %52 = arith.muli %arg0, %c128_i32_30 : i32
      %53 = vector.broadcast %52 : i32 to vector<128x1xi32>
      %54 = arith.addi %51, %53 : vector<128x1xi32>
      %c0_31 = arith.constant 0 : index
      %c0_32 = arith.constant 0 : index
      %55 = vector.load %arg9[%c0_31, %c0_32] : memref<128x1xf32, #tpu.memory_space<vmem>>, vector<128x1xf32>
      %c0_33 = arith.constant 0 : index
      %c0_34 = arith.constant 0 : index
      %56 = vector.load %arg10[%c0_33, %c0_34] : memref<128x1xf32, #tpu.memory_space<vmem>>, vector<128x1xf32>
      %57 = math.log %56 : vector<128x1xf32>
      %58 = arith.addf %55, %57 : vector<128x1xf32>
      %c0_35 = arith.constant 0 : index
      %c0_36 = arith.constant 0 : index
      %59 = vector.load %arg11[%c0_35, %c0_36] : memref<128x1xf32, #tpu.memory_space<vmem>>, vector<128x1xf32>
      %c0_37 = arith.constant 0 : index
      %c0_38 = arith.constant 0 : index
      %60 = vector.load %arg7[%c0_37, %c0_38] : memref<128x1xf32, #tpu.memory_space<vmem>>, vector<128x1xf32>
      %61 = arith.mulf %59, %60 : vector<128x1xf32>
      %62 = arith.subf %58, %61 : vector<128x1xf32>
      %c16_i32 = arith.constant 16 : i32
      %63 = vector.broadcast %c16_i32 : i32 to vector<128x1xi32>
      %64 = arith.cmpi slt, %54, %63 : vector<128x1xi32>
      %cst_39 = arith.constant 0.000000e+00 : f32
      %65 = vector.broadcast %cst_39 : f32 to vector<128x1xf32>
      %66 = arith.select %64, %62, %65 : vector<128x1xi1>, vector<128x1xf32>
      %c0_40 = arith.constant 0 : index
      %c0_41 = arith.constant 0 : index
      %67 = vector.load %arg8[%c0_40, %c0_41] : memref<128x1xf32, #tpu.memory_space<vmem>>, vector<128x1xf32>
      tpu.vector_store %arg8[%c0_40, %c0_41], %66 {strides = array<i32>} : memref<128x1xf32, #tpu.memory_space<vmem>>, vector<128x1xf32>,
    } else {
    }
    return
  }
  func.func @transform_0(%arg0: i32, %arg1: i32) -> (i32, i32) {
    %c0_i32 = arith.constant 0 : i32
    %c0_i32_0 = arith.constant 0 : i32
    return %arg0, %c0_i32 : i32, i32
  }
  func.func @transform_1(%arg0: i32, %arg1: i32) -> (i32, i32) {
    %c0_i32 = arith.constant 0 : i32
    %c0_i32_0 = arith.constant 0 : i32
    return %c0_i32, %arg1 : i32, i32
  }
  func.func @transform_2(%arg0: i32, %arg1: i32) -> (i32, i32) {
    %c0_i32 = arith.constant 0 : i32
    %c0_i32_0 = arith.constant 0 : i32
    return %arg0, %c0_i32 : i32, i32
  }
  func.func @transform_3(%arg0: i32, %arg1: i32) -> (i32, i32) {
    %c0_i32 = arith.constant 0 : i32
    %c0_i32_0 = arith.constant 0 : i32
    return %c0_i32, %arg1 : i32, i32
  }
  func.func @transform_4(%arg0: i32, %arg1: i32) -> (i32, i32) {
    %c0_i32 = arith.constant 0 : i32
    %c0_i32_0 = arith.constant 0 : i32
    return %c0_i32, %arg1 : i32, i32
  }
  func.func @transform_5(%arg0: i32, %arg1: i32) -> (i32, i32) {
    %c0_i32 = arith.constant 0 : i32
    %c0_i32_0 = arith.constant 0 : i32
    return %arg0, %c0_i32 : i32, i32
  }
  func.func @transform_6(%arg0: i32, %arg1: i32) -> (i32, i32) {
    %c0_i32 = arith.constant 0 : i32
    %c0_i32_0 = arith.constant 0 : i32
    return %arg0, %c0_i32 : i32, i32
  }
}

</mosaic_0001>

<bundles_post_ra>
// kernel: tpu_custom_call.1
= control target key start
LH: loop header
LB: loop body
LE: loop exit
PB: predicated region body
PF: predicated region fallthrough
CT: control target
= control target key end

     0   :  { %v1333_v1 = vmov 0   ;;  %vm2347_vm0 = vcmask 7168   ;;  %v1334_v28 = vmov -inf   ;;  %v302_v31 = vlaneseq  ;;  %s2340_s1 = inlined_call_operand.vmem [shape: bf16[128,128], index: 1, kind: input, shape index: {}]   ;;  %s2341_s0 = inlined_call_operand.vmem [shape: bf16[128,128], index: 0, kind: input, shape index: {}]   ;;  %s2342_s2 = inlined_call_operand.vmem [shape: s32[128,1], index: 2, kind: input, shape index: {}]   ;;  %s2343_s3 = inlined_call_operand.vmem [shape: s32[1,128], index: 3, kind: input, shape index: {}]   ;;  %s2344_s4 = inlined_call_operand.vmem [shape: f32[1,128], index: 4, kind: input, shape index: {}]   ;;  %s2345_s6 = inlined_call_operand.vmem [shape: f32[128,1], index: 6, kind: output, shape index: {}]   ;;  %s2346_s5 = inlined_call_operand.vmem [shape: f32[128,1], index: 5, kind: input, shape index: {}]  }
   0x1   :  { %v1249_v0 = vld [vmem:[%s2340_s1] sm:$0xff]   ;;  %1247 = vset.pattern.permute.xlu1 %v1333_v1  ;;  %1248 = vset.pattern.permute.xlu0 %v1333_v1  ;;  %v1250_v2 = vld [vmem:[%s2340_s1 + $0x8] sm:$0xff]   ;;  %v1251_v3 = vld [vmem:[%s2340_s1 + $0x10] sm:$0xff]   ;;  %39 = vst.msk [vmem:[#allocation2 + $0x50] sm:$0xff] %vm2347_vm0, %v1334_v28  ;;  %v2387_v60 = vmov 0 }
   0x2   :  { %1196 = vmatprep.subr.bf16.mxu0 %v1249_v0  ;;  %1228 = vmatprep.subr.bf16.mxu1 %v1249_v0  ;;  %v1252_v4 = vld [vmem:[%s2340_s1 + $0x18] sm:$0xff]   ;;  %v1257_v5 = vld [vmem:[%s2341_s0] sm:$0xff]   ;;  %v1254_v8 = vld [vmem:[%s2340_s1 + $0x28] sm:$0xff]   ;;  %29 = vst.msk [vmem:[#allocation2] sm:$0xff] %vm2347_vm0, %v1334_v28  ;;  %v1468_v33 = vshrl.u32 %v302_v31, 7  ;;  %v1472_v36 = vand.u32 127, %v302_v31 }
   0x3   :  { %1197 = vmatpush3.bf16.msra.mxu0 %v1249_v0  ;;  %1236 = vmatpush3.bf16.msra.mxu1 %v1249_v0  ;;  %v1258_v6 = vld [vmem:[%s2341_s0 + $0x20] sm:$0xff]   ;;  %v750_v10 = vld [vmem:[%s2342_s2 + $0x8] sm:$0xff]  ;;  %v751_v11 = vld [vmem:[%s2342_s2 + $0x10] sm:$0xff]  ;;  %30 = vst.msk [vmem:[#allocation2 + $0x8] sm:$0xff] %vm2347_vm0, %v1334_v28 }
   0x4   :  { %1198 = vmatprep.subr.bf16.mxu0 %v1250_v2  ;;  %1229 = vmatprep.subr.bf16.mxu1 %v1250_v2  ;;  %v1253_v7 = vld [vmem:[%s2340_s1 + $0x20] sm:$0xff]   ;;  %v1255_v13 = vld [vmem:[%s2340_s1 + $0x30] sm:$0xff]   ;;  %v752_v14 = vld [vmem:[%s2342_s2 + $0x18] sm:$0xff]  ;;  %31 = vst.msk [vmem:[#allocation2 + $0x10] sm:$0xff] %vm2347_vm0, %v1334_v28  ;;  %v305_v37 = vadd.s32 16, %v1468_v33  ;;  %v304_v38 = vadd.s32 8, %v1468_v33  ;;  %v321_v43 = vsub.s32 %v1468_v33, %v1472_v36 }
   0x5   :  { %1212 = vmatprep.mubr.bf16.mxu0 %v1257_v5  ;;  %1220 = vmatprep.mubr.bf16.mxu1 %v1258_v6  ;;  %v749_v9 = vld [vmem:[%s2342_s2] sm:$0xff]  ;;  %v755_v15 = vld [vmem:[%s2342_s2 + $0x30] sm:$0xff]  ;;  %v1256_v16 = vld [vmem:[%s2340_s1 + $0x38] sm:$0xff]   ;;  %32 = vst.msk [vmem:[#allocation2 + $0x18] sm:$0xff] %vm2347_vm0, %v1334_v28  ;;  %v313_v39 = vadd.s32 80, %v1468_v33  ;;  %v306_v41 = vadd.s32 24, %v1468_v33 }
   0x6   :  { %767 = vperm.xlu1 %1247, %v749_v9   ;;  %770 = vperm.xlu0 %1248, %v750_v10   ;;  %v753_v12 = vld [vmem:[%s2342_s2 + $0x20] sm:$0xff]  ;;  %v754_v17 = vld [vmem:[%s2342_s2 + $0x28] sm:$0xff]  ;;  %v756_v21 = vld [vmem:[%s2342_s2 + $0x38] sm:$0xff]  ;;  %33 = vst.msk [vmem:[#allocation2 + $0x20] sm:$0xff] %vm2347_vm0, %v1334_v28  ;;  %v323_v40 = vsub.s32 %v305_v37, %v1472_v36  ;;  %v312_v44 = vadd.s32 72, %v1468_v33  ;;  %v322_v47 = vsub.s32 %v304_v38, %v1472_v36  ;;  %v309_v48 = vadd.s32 48, %v1468_v33 }
   0x7   :  { %1199 = vmatpush3.bf16.msra.mxu0 %v1250_v2  ;;  %1237 = vmatpush3.bf16.msra.mxu1 %v1250_v2  ;;  %v757_v18 = vld [vmem:[%s2342_s2 + $0x40] sm:$0xff]  ;;  %v1259_v19 = vld [vmem:[%s2341_s0 + $0x8] sm:$0xff]   ;;  %v1261_v22 = vld [vmem:[%s2341_s0 + $0x10] sm:$0xff]   ;;  %34 = vst.msk [vmem:[#allocation2 + $0x28] sm:$0xff] %vm2347_vm0, %v1334_v28  ;;  %v331_v49 = vsub.s32 %v313_v39, %v1472_v36  ;;  %v324_v51 = vsub.s32 %v306_v41, %v1472_v36  ;;  %vm1501_vm4 = vcmp.ne.s32.totalorder %v321_v43, 0  ;;  %v307_v54 = vadd.s32 32, %v1468_v33 }
   0x8   :  { %1200 = vmatprep.subr.bf16.mxu0 %v1251_v3  ;;  %1230 = vmatprep.subr.bf16.mxu1 %v1251_v3  ;;  %v1260_v20 = vld [vmem:[%s2341_s0 + $0x28] sm:$0xff]   ;;  %v1263_v23 = vld [vmem:[%s2341_s0 + $0x30] sm:$0xff]   ;;  %v1262_v25 = vld [vmem:[%s2341_s0 + $0x18] sm:$0xff]   ;;  %35 = vst.msk [vmem:[#allocation2 + $0x30] sm:$0xff] %vm2347_vm0, %v1334_v28  ;;  %vm1495_vm2 = vcmp.ne.s32.totalorder %v323_v40, 0  ;;  %v330_v53 = vsub.s32 %v312_v44, %v1472_v36  ;;  %v310_v55 = vadd.s32 56, %v1468_v33  ;;  %v327_v58 = vsub.s32 %v309_v48, %v1472_v36 }
   0x9   :  { %v758_v24 = vld [vmem:[%s2342_s2 + $0x48] sm:$0xff]  ;;  %v1264_v26 = vld [vmem:[%s2341_s0 + $0x38] sm:$0xff]   ;;  %36 = vst.msk [vmem:[#allocation2 + $0x38] sm:$0xff] %vm2347_vm0, %v1334_v28  ;;  %37 = vst.msk [vmem:[#allocation2 + $0x40] sm:$0xff] %vm2347_vm0, %v1334_v28  ;;  %vm1514_vm6 = vcmp.ne.s32.totalorder %v322_v47, 0  ;;  %v308_v59 = vadd.s32 40, %v1468_v33 }
   0xa   :  { %773 = vperm.xlu1 %1247, %v751_v11   ;;  %779 = vperm.xlu0 %1248, %v753_v12   ;;  %v760_v27 = vld [vmem:[%s2342_s2 + $0x58] sm:$0xff]  ;;  %38 = vst.msk [vmem:[#allocation2 + $0x48] sm:$0xff] %vm2347_vm0, %v1334_v28  ;;  %40 = vst.msk [vmem:[#allocation2 + $0x58] sm:$0xff] %vm2347_vm0, %v1334_v28  ;;  %v1482_v42 = vld [vmem:[%s2343_s3] ss:$0 sm:$0xff]  ;;  %vm1529_vm9 = vcmp.ne.s32.totalorder %v324_v51, 0  ;;  %v328_v12 = vsub.s32 %v310_v55, %v1472_v36 }
   0xb   :  { %1201 = vmatpush3.bf16.msra.mxu0 %v1251_v3  ;;  %1238 = vmatpush3.bf16.msra.mxu1 %v1251_v3  ;;  %41 = vst.msk [vmem:[#allocation2 + $0x60] sm:$0xff] %vm2347_vm0, %v1334_v28  ;;  %42 = vst.msk [vmem:[#allocation2 + $0x68] sm:$0xff] %vm2347_vm0, %v1334_v28  ;;  %v1512_v56 = vld [vmem:[%s2344_s4] ss:$0 sm:$0xff]  ;;  %v311_v0 = vadd.s32 64, %v1468_v33  ;;  %v314_v1 = vadd.s32 88, %v1468_v33 }
   0xc   :  { %1202 = vmatprep.subr.bf16.mxu0 %v1252_v4  ;;  %1231 = vmatprep.subr.bf16.mxu1 %v1252_v4  ;;  %43 = vst.msk [vmem:[#allocation2 + $0x70] sm:$0xff] %vm2347_vm0, %v1334_v28  ;;  %44 = vst.msk [vmem:[#allocation2 + $0x78] sm:$0xff] %vm2347_vm0, %v1334_v28  ;;  %vm1548_vm12 = vcmp.ne.s32.totalorder %v331_v49, 0  ;;  %v2393_v5 = vmov 0  ;;  %vm1552_vm13 = vcmp.ne.s32.totalorder %v330_v53, 0 }
   0xd   :  { %v2394_v5 = vsel %vm1548_vm12, 4294967295, %v2393_v5  ;;  %v329_v28 = vsub.s32 %v311_v0, %v1472_v36 }
   0xe   :  { %776 = vperm.xlu1 %1247, %v752_v14   ;;  %785 = vperm.xlu0 %1248, %v755_v15  }
   0xf   :  { %1203 = vmatpush3.bf16.msra.mxu0 %v1252_v4  ;;  %1239 = vmatpush3.bf16.msra.mxu1 %v1252_v4 }
  0x10   :  { %1204 = vmatprep.subr.bf16.mxu0 %v1253_v7  ;;  %1232 = vmatprep.subr.bf16.mxu1 %v1253_v7 }
  0x12   :  { %782 = vperm.xlu1 %1247, %v754_v17   ;;  %791 = vperm.xlu0 %1248, %v757_v18   ;;  %v326_v18 = vsub.s32 %v308_v59, %v1472_v36  ;;  %v2425_v59 = vmov 0  ;;  %v315_v17 = vadd.s32 96, %v1468_v33 }
  0x13   :  { %1205 = vmatpush3.bf16.msra.mxu0 %v1253_v7  ;;  %1240 = vmatpush3.bf16.msra.mxu1 %v1253_v7  ;;  %v325_v7 = vsub.s32 %v307_v54, %v1472_v36  ;;  %v2421_v54 = vmov 0 }
  0x14   :  { %1206 = vmatprep.subr.bf16.mxu0 %v1254_v8  ;;  %1233 = vmatprep.subr.bf16.mxu1 %v1254_v8  ;;  %vm1646_vm15 = vcmp.ne.s32.totalorder %v326_v18, 0 }
  0x15   :  { %vm1627_vm0 = vcmp.ne.s32.totalorder %v325_v7, 0  ;;  %v317_v7 = vadd.s32 112, %v1468_v33 }
  0x16   :  { %788 = vperm.xlu1 %1247, %v756_v21  }
  0x17   :  { %1207 = vmatpush3.bf16.msra.mxu0 %v1254_v8  ;;  %1241 = vmatpush3.bf16.msra.mxu1 %v1254_v8 }
  0x18   :  { %1208 = vmatprep.subr.bf16.mxu0 %v1255_v13  ;;  %1234 = vmatprep.subr.bf16.mxu1 %v1255_v13 }
  0x1a   :  { %794 = vperm.xlu1 %1247, %v758_v24  }
  0x1b   :  { %1209 = vmatpush3.bf16.msra.mxu0 %v1255_v13  ;;  %1242 = vmatpush3.bf16.msra.mxu1 %v1255_v13 }
  0x1c   :  { %1210 = vmatprep.subr.bf16.mxu0 %v1256_v16  ;;  %1235 = vmatprep.subr.bf16.mxu1 %v1256_v16 }
  0x1e   :  { %800 = vperm.xlu1 %1247, %v760_v27   ;;  %v2403_v27 = vmov 0 }
  0x1f   :  { %1211 = vmatpush3.bf16.msra.mxu0 %v1256_v16  ;;  %1243 = vmatpush3.bf16.msra.mxu1 %v1256_v16 }
  0x22   :  { %1213 = vmatmul.mubr.bf16.vlgmr.msra.gmra.mrb[0].mxu0 %v1259_v19  ;;  %1221 = vmatmul.mubr.bf16.vlgmr.msra.gmra.mrb[0].mxu1 %v1260_v20  ;;  %v1941_v19 = vld [vmem:[#allocation2 + $0x58] sm:$0xff] }
  0x23   :  { %1216 = vmatprep.mubr.bf16.mxu0 %v1261_v22  ;;  %1224 = vmatprep.mubr.bf16.mxu1 %v1263_v23  ;;  %2474 = vst [vmem:[#allocation15_spill] sm:$0xff] %v1941_v19 }
  0x2a   :  { %1217 = vmatmul.mubr.bf16.gmra.mrb[4].mxu0 %v1262_v25  ;;  %1225 = vmatmul.mubr.bf16.gmra.mrb[4].mxu1 %v1264_v26 }
  0x85   :  { %v768_v29 = vpop.permute.xlu1 %767  ;;  %v771_v34 = vpop.permute.xlu0 %770 }
  0x86   :  { %vm818_vm3 = vcmp.eq.s32.totalorder %v768_v29, %v1482_v42  ;;  %vm819_vm5 = vcmp.eq.s32.totalorder %v771_v34, %v1482_v42  ;;  %v1922_v34 = vld [vmem:[#allocation2 + $0x18] sm:$0xff] }
  0x87   :  { %vm1539_vm10 = vmand %vm818_vm3, %vm1501_vm4  ;;  %2468 = vst [vmem:[#allocation11_spill] sm:$0xff] %v1922_v34 }
  0x88   :  { %vm1573_vm14 = vmand %vm819_vm5, %vm1514_vm6 }
  0x89   :  { %v774_v30 = vpop.permute.xlu1 %773  ;;  %v1487_v45 = vpop.permute.xlu0 %779 }
  0x8a   :  { %vm820_vm1 = vcmp.eq.s32.totalorder %v774_v30, %v1482_v42  ;;  %v332_v30 = vsub.s32 %v314_v1, %v1472_v36 }
  0x8b   :  { %vm1524_vm7 = vmand %vm820_vm1, %vm1495_vm2  ;;  %vm1582_vm1 = vcmp.ne.s32.totalorder %v327_v58, 0 }
  0x8c   :  { %v2388_v60 = vsel %vm1524_vm7, 4294967295, %v2387_v60 }
  0x8d   :  { %v777_v32 = vpop.permute.xlu1 %776  ;;  %v786_v61 = vpop.permute.xlu0 %785 }
  0x8e   :  { %vm821_vm8 = vcmp.eq.s32.totalorder %v777_v32, %v1482_v42  ;;  %v1939_v32 = vld [vmem:[#allocation2 + $0x40] sm:$0xff] }
  0x8f   :  { %vm1594_vm3 = vmand %vm821_vm8, %vm1529_vm9  ;;  %2473 = vst [vmem:[#allocation14_spill] sm:$0xff] %v1939_v32 }
  0x91   :  { %v1470_v35 = vpop.permute.xlu1 %782 }
  0x95   :  { %v1489_v46 = vpop.permute.xlu1 %788 }
  0x99   :  { %v795_v62 = vpop.permute.xlu1 %794 }
  0x9a   :  { %vm827_vm11 = vcmp.eq.s32.totalorder %v795_v62, %v1482_v42 }
  0x9b   :  { %vm1618_vm5 = vmand %vm827_vm11, %vm1552_vm13  ;;  %vm823_vm11 = vcmp.eq.s32.totalorder %v1470_v35, %v1482_v42 }
  0x9c   :  { %v2404_v27 = vsel %vm1618_vm5, 4294967295, %v2403_v27 }
  0xf5   :  { %v1544_v3 = vpop.f32.mrb[0].mxu0  ;;  %v1546_v4 = vpop.f32.mrb[0].mxu1 }
  0xf6   :  { %v366_v8 = vadd.f32 %v1544_v3, %v1512_v56  ;;  %v374_v9 = vadd.f32 %v1546_v4, %v1512_v56  ;;  %v1561_v10 = vpop.f32.mrb[1].mxu0  ;;  %v1563_v11 = vpop.f32.mrb[1].mxu1 }
  0xf7   :  { %v1578_v15 = vpop.f32.mrb[2].mxu0  ;;  %v1580_v16 = vpop.f32.mrb[2].mxu1  ;;  %v364_v21 = vadd.f32 %v1512_v56, %v1561_v10  ;;  %v372_v40 = vadd.f32 %v1512_v56, %v1563_v11 }
  0xf8   :  { %v367_v22 = vadd.f32 %v1578_v15, %v1512_v56  ;;  %v1602_v23 = vpop.f32.mrb[3].mxu0  ;;  %v1606_v24 = vsel %vm1548_vm12, %v374_v9, -1e+30  ;;  %v1608_v25 = vpop.f32.mrb[3].mxu1  ;;  %v1612_v26 = vsel %vm1495_vm2, %v366_v8, -1e+30  ;;  %vm2411_vm12 = vcmp.eq.s32.totalorder %v786_v61, %v1482_v42 }
  0xf9   :  { %432 = vmax.xlane.f32.xlu0 %v1606_v24  ;;  %416 = vmax.xlane.f32.xlu1 %v1612_v26  ;;  %vm1632_vm2 = vcmp.ne.s32.totalorder %v328_v12, 0  ;;  %vm1654_vm7 = vmand %vm2411_vm12, %vm1582_vm1  ;;  %v375_v41 = vadd.f32 %v1580_v16, %v1512_v56  ;;  %v1667_v43 = vsel %vm1501_vm4, %v364_v21, -1e+30  ;;  %vm2414_vm12 = vcmp.eq.s32.totalorder %v1487_v45, %v1482_v42  ;;  %v1920_v9 = vld [vmem:[#allocation2] sm:$0xff] }
  0xfa   :  { %v1671_v44 = vsel %vm1529_vm9, %v367_v22, -1e+30  ;;  %vm1678_vm8 = vmand %vm2414_vm12, %vm1627_vm0  ;;  %vm1704_vm9 = vcmp.ne.s32.totalorder %v329_v28, 0  ;;  %vm1708_vm12 = vcmp.ne.s32.totalorder %v332_v30, 0  ;;  %v365_v61 = vadd.f32 %v1512_v56, %v1602_v23  ;;  %2467 = vst [vmem:[#allocation10_spill] sm:$0xff] %v1920_v9 }
  0xfb   :  { %vm1700_vm4 = vmand %vm823_vm11, %vm1646_vm15  ;;  %v2422_v54 = vsel %vm1708_vm12, 4294967295, %v2421_v54  ;;  %vm2424_vm11 = vcmp.eq.s32.totalorder %v1489_v46, %v1482_v42  ;;  %v373_v62 = vadd.f32 %v1512_v56, %v1608_v25  ;;  %v1734_v63 = vsel %vm1704_vm9, %v372_v40, -1e+30 }
  0xfc   :  { %vm1724_vm5 = vmand %vm2424_vm11, %vm1632_vm2  ;;  %v1738_v0 = vsel %vm1708_vm12, %v375_v41, -1e+30  ;;  %v318_v8 = vadd.s32 120, %v1468_v33  ;;  %v1764_v28 = vsel %vm1514_vm6, %v365_v61, -1e+30  ;;  %v335_v30 = vsub.s32 %v317_v7, %v1472_v36 }
  0xfd   :  { %412 = vmax.xlane.f32.xlu0 %v1667_v43  ;;  %418 = vmax.xlane.f32.xlu1 %v1671_v44  ;;  %v1684_v48 = vpop.f32.mrb[4].mxu0  ;;  %v1686_v49 = vpop.f32.mrb[4].mxu1  ;;  %v2426_v59 = vsel %vm1724_vm5, 4294967295, %v2425_v59  ;;  %v1760_v22 = vsel %vm1552_vm13, %v373_v62, -1e+30  ;;  %v2427_v61 = vmov 0 }
  0xfe   :  { %v1688_v50 = vpop.f32.mrb[5].mxu0  ;;  %v1690_v51 = vpop.f32.mrb[5].mxu1  ;;  %v370_v18 = vadd.f32 %v1684_v48, %v1512_v56  ;;  %v336_v40 = vsub.s32 %v318_v8, %v1472_v36  ;;  %v378_v41 = vadd.f32 %v1686_v49, %v1512_v56  ;;  %vm1784_vm6 = vcmp.ne.s32.totalorder %v335_v30, 0 }
  0xff   :  { %v1712_v55 = vpop.f32.mrb[6].mxu0  ;;  %v1714_v58 = vpop.f32.mrb[6].mxu1  ;;  %v2428_v61 = vsel %vm1784_vm6, 4294967295, %v2427_v61  ;;  %v2429_v7 = vmov 0  ;;  %v316_v8 = vadd.s32 104, %v1468_v33  ;;  %v368_v31 = vadd.f32 %v1512_v56, %v1688_v50 }
 0x100   :  { %2423 = vst [vmem:[#allocation5_spill] sm:$0xff] %v1714_v58  ;;  %v1740_v1 = vpop.f32.mrb[7].mxu0  ;;  %v1742_v46 = vpop.f32.mrb[7].mxu1  ;;  %v371_v21 = vadd.f32 %v1712_v55, %v1512_v56  ;;  %v379_v6 = vadd.f32 %v1714_v58, %v1512_v56  ;;  %v1776_v62 = vsel %vm1582_vm1, %v370_v18, -1e+30  ;;  %vm1788_vm13 = vcmp.ne.s32.totalorder %v336_v40, 0 }
 0x101   :  { %428 = vmax.xlane.f32.xlu0 %v1734_v63  ;;  %434 = vmax.xlane.f32.xlu1 %v1738_v0  ;;  %v2430_v7 = vsel %vm1788_vm13, 4294967295, %v2429_v7  ;;  %v369_v18 = vadd.f32 %v1512_v56, %v1740_v1  ;;  %v333_v33 = vsub.s32 %v315_v17, %v1472_v36  ;;  %v334_v40 = vsub.s32 %v316_v8, %v1472_v36  ;;  %v1906_v8 = vpop.permute.xlu0 %791  ;;  %v2040_v58 = vld [vmem:[#allocation2 + $0x68] sm:$0xff] }
 0x102   :  { %v1780_v57 = vsel %vm1632_vm2, %v371_v21, -1e+30  ;;  %v1800_v21 = vsel %vm1784_vm6, %v378_v41, -1e+30  ;;  %v1804_v30 = vsel %vm1788_vm13, %v379_v6, -1e+30  ;;  %v376_v39 = vadd.f32 %v1512_v56, %v1690_v51 }
 0x103   :  { %v377_v12 = vadd.f32 %v1512_v56, %v1742_v46  ;;  %v1816_v41 = vsel %vm1627_vm0, %v368_v31, -1e+30  ;;  %v1820_v6 = vsel %vm1646_vm15, %v369_v18, -1e+30  ;;  %vm1824_vm1 = vcmp.ne.s32.totalorder %v333_v33, 0  ;;  %v1908_v31 = vpop.permute.xlu1 %800  ;;  %v1910_v18 = vld [vmem:[#allocation2 + $0x50] sm:$0xff] }
 0x104   :  { %vm1828_vm2 = vcmp.ne.s32.totalorder %v334_v40, 0  ;;  %v2355_v56 = vmov 0.0   ;;  %vm2435_vm0 = vcmask 7168   ;;  %v1898_v29 = vsel %vm1824_vm1, %v376_v39, -1e+30  ;;  %2463 = vst [vmem:[#allocation6_spill] sm:$0xff] %v1910_v18 }
 0x105   :  { %430 = vmax.xlane.f32.xlu1 %v1760_v22  ;;  %414 = vmax.xlane.f32.xlu0 %v1764_v28  ;;  %61 = vst.msk [vmem:[#allocation4] sm:$0xff] %vm2435_vm0, %v2355_v56  ;;  %vm2436_vm11 = vmmov %vm2435_vm0  ;;  %v1902_v37 = vsel %vm1828_vm2, %v377_v12, -1e+30  ;;  %v1912_v33 = vld [vmem:[#allocation2 + $0x10] sm:$0xff]  ;;  %v2504_v2 = vsel %vm1654_vm7, %v1684_v48, 0.0  ;;  %v2506_v38 = vsel %vm1594_vm3, %v1578_v15, 0.0  ;;  %vm2508_vm7 = vnez %v2426_v59 }
 0x106   :  { %45 = vst.msk [vmem:[#allocation3] sm:$0xff] %vm2436_vm11, %v2355_v56  ;;  %vm2437_vm15 = vmmov %vm2435_vm0  ;;  %v2507_v14 = vsel %vm1700_vm4, %v1740_v1, 0.0  ;;  %v2509_v15 = vsel %vm2508_vm7, %v1712_v55, 0.0  ;;  %vm829_vm3 = vcmp.eq.s32.totalorder %v1908_v31, %v1482_v42 }
 0x107   :  { %46 = vst.msk [vmem:[#allocation3 + $0x8] sm:$0xff] %vm2437_vm15, %v2355_v56  ;;  %vm2438_vm13 = vmmov %vm2435_vm0 }
 0x108   :  { %47 = vst.msk [vmem:[#allocation3 + $0x10] sm:$0xff] %vm2438_vm13, %v2355_v56  ;;  %vm2439_vm6 = vmmov %vm2435_vm0 }
 0x109   :  { %424 = vmax.xlane.f32.xlu0 %v1776_v62  ;;  %426 = vmax.xlane.f32.xlu1 %v1780_v57  ;;  %48 = vst.msk [vmem:[#allocation3 + $0x18] sm:$0xff] %vm2439_vm6, %v2355_v56  ;;  %vm2440_vm12 = vmmov %vm2435_vm0 }
 0x10a   :  { %49 = vst.msk [vmem:[#allocation3 + $0x20] sm:$0xff] %vm2440_vm12, %v2355_v56  ;;  %vm2441_vm5 = vmmov %vm2435_vm0 }
 0x10b   :  { %50 = vst.msk [vmem:[#allocation3 + $0x28] sm:$0xff] %vm2441_vm5, %v2355_v56  ;;  %vm2442_vm11 = vmmov %vm2435_vm0 }
 0x10c   :  { %51 = vst.msk [vmem:[#allocation3 + $0x30] sm:$0xff] %vm2435_vm0, %v2355_v56  ;;  %vm2443_vm15 = vmmov %vm2435_vm0 }
 0x10d   :  { %440 = vmax.xlane.f32.xlu0 %v1800_v21  ;;  %442 = vmax.xlane.f32.xlu1 %v1804_v30  ;;  %52 = vst.msk [vmem:[#allocation3 + $0x38] sm:$0xff] %vm2442_vm11, %v2355_v56  ;;  %vm2444_vm13 = vmmov %vm2435_vm0 }
 0x10e   :  { %53 = vst.msk [vmem:[#allocation3 + $0x40] sm:$0xff] %vm2443_vm15, %v2355_v56  ;;  %vm2445_vm6 = vmmov %vm2435_vm0 }
 0x10f   :  { %54 = vst.msk [vmem:[#allocation3 + $0x48] sm:$0xff] %vm2444_vm13, %v2355_v56  ;;  %vm2446_vm12 = vmmov %vm2435_vm0 }
 0x110   :  { %55 = vst.msk [vmem:[#allocation3 + $0x50] sm:$0xff] %vm2445_vm6, %v2355_v56  ;;  %vm2447_vm5 = vmmov %vm2435_vm0 }
 0x111   :  { %420 = vmax.xlane.f32.xlu0 %v1816_v41  ;;  %422 = vmax.xlane.f32.xlu1 %v1820_v6  ;;  %56 = vst.msk [vmem:[#allocation3 + $0x58] sm:$0xff] %vm2446_vm12, %v2355_v56  ;;  %vm2448_vm11 = vmmov %vm2435_vm0 }
 0x112   :  { %57 = vst.msk [vmem:[#allocation3 + $0x60] sm:$0xff] %vm2447_vm5, %v2355_v56  ;;  %vm2449_vm15 = vmmov %vm2435_vm0 }
 0x113   :  { %58 = vst.msk [vmem:[#allocation3 + $0x68] sm:$0xff] %vm2435_vm0, %v2355_v56  ;;  %vm2450_vm13 = vmmov %vm2435_vm0 }
 0x114   :  { %59 = vst.msk [vmem:[#allocation3 + $0x70] sm:$0xff] %vm2448_vm11, %v2355_v56  ;;  %vm2451_vm6 = vmmov %vm2435_vm0 }
 0x115   :  { %60 = vst.msk [vmem:[#allocation3 + $0x78] sm:$0xff] %vm2449_vm15, %v2355_v56  ;;  %vm2452_vm12 = vmmov %vm2435_vm0  ;;  %436 = vmax.xlane.f32.xlu0 %v1898_v29  ;;  %438 = vmax.xlane.f32.xlu1 %v1902_v37 }
 0x116   :  { %62 = vst.msk [vmem:[#allocation4 + $0x8] sm:$0xff] %vm2450_vm13, %v2355_v56  ;;  %vm2453_vm5 = vmmov %vm2435_vm0 }
 0x117   :  { %63 = vst.msk [vmem:[#allocation4 + $0x10] sm:$0xff] %vm2451_vm6, %v2355_v56  ;;  %vm2454_vm11 = vmmov %vm2435_vm0 }
 0x118   :  { %64 = vst.msk [vmem:[#allocation4 + $0x18] sm:$0xff] %vm2452_vm12, %v2355_v56  ;;  %vm2455_vm15 = vmmov %vm2435_vm0 }
 0x119   :  { %65 = vst.msk [vmem:[#allocation4 + $0x20] sm:$0xff] %vm2453_vm5, %v2355_v56  ;;  %vm2456_vm13 = vmmov %vm2435_vm0 }
 0x11a   :  { %66 = vst.msk [vmem:[#allocation4 + $0x28] sm:$0xff] %vm2435_vm0, %v2355_v56  ;;  %vm2457_vm6 = vmmov %vm2435_vm0 }
 0x11b   :  { %67 = vst.msk [vmem:[#allocation4 + $0x30] sm:$0xff] %vm2454_vm11, %v2355_v56  ;;  %vm2458_vm12 = vmmov %vm2435_vm0 }
 0x11c   :  { %68 = vst.msk [vmem:[#allocation4 + $0x38] sm:$0xff] %vm2455_vm15, %v2355_v56  ;;  %vm2459_vm5 = vmmov %vm2435_vm0 }
 0x11d   :  { %69 = vst.msk [vmem:[#allocation4 + $0x40] sm:$0xff] %vm2456_vm13, %v2355_v56  ;;  %vm2460_vm11 = vmmov %vm2435_vm0 }
 0x11e   :  { %70 = vst.msk [vmem:[#allocation4 + $0x48] sm:$0xff] %vm2457_vm6, %v2355_v56  ;;  %vm2461_vm15 = vmmov %vm2435_vm0 }
 0x11f   :  { %71 = vst.msk [vmem:[#allocation4 + $0x50] sm:$0xff] %vm2458_vm12, %v2355_v56  ;;  %vm2462_vm13 = vmmov %vm2435_vm0 }
 0x120   :  { %72 = vst.msk [vmem:[#allocation4 + $0x58] sm:$0xff] %vm2459_vm5, %v2355_v56  ;;  %2464 = vst [vmem:[#allocation7_spill] sm:$0xff] %v1912_v33 }
 0x121   :  { %73 = vst.msk [vmem:[#allocation4 + $0x60] sm:$0xff] %vm2435_vm0, %v2355_v56  ;;  %vm2469_vm6 = vmmov %vm2435_vm0 }
 0x122   :  { %74 = vst.msk [vmem:[#allocation4 + $0x68] sm:$0xff] %vm2460_vm11, %v2355_v56  ;;  %vm2470_vm12 = vmmov %vm2435_vm0 }
 0x123   :  { %75 = vst.msk [vmem:[#allocation4 + $0x70] sm:$0xff] %vm2461_vm15, %v2355_v56  ;;  %vm2475_vm5 = vmmov %vm2435_vm0 }
 0x124   :  { %76 = vst.msk [vmem:[#allocation4 + $0x78] sm:$0xff] %vm2462_vm13, %v2355_v56  ;;  %vm2480_vm11 = vmmov %vm2435_vm0 }
 0x125   :  { %vm2481_vm15 = vmmov %vm2435_vm0  ;;  %2495 = vst [vmem:[#allocation28_spill] sm:$0xff] %v2040_v58 }
 0x126   :  { %vm2486_vm13 = vmmov %vm2435_vm0 }
 0x186   :  { %v433_v40 = vpop.xlane.xlu0 %432  ;;  %v417_v56 = vpop.xlane.xlu1 %416 }
 0x187   :  { %v1915_v39 = vmax.f32 %v1910_v18, %v433_v40  ;;  %v1918_v12 = vmax.f32 %v1912_v33, %v417_v56  ;;  %v1961_v33 = vld [vmem:[#allocation2 + $0x8] sm:$0xff] }
 0x188   :  { %2479 = vst [vmem:[#allocation19_spill] sm:$0xff] %v1961_v33 }
 0x189   :  { %2465 = vst [vmem:[#allocation8_spill] sm:$0xff] %v1915_v39  ;;  %2466 = vst [vmem:[#allocation9_spill] sm:$0xff] %v1918_v12  ;;  %520 = vperm.xlu1 %1247, %v1918_v12  }
 0x18a   :  { %743 = vst.msk [vmem:[#allocation2 + $0x50] sm:$0xff] %vm2469_vm6, %v1915_v39  ;;  %v413_v56 = vpop.xlane.xlu0 %412  ;;  %v419_v40 = vpop.xlane.xlu1 %418  ;;  %vm2487_vm6 = vmmov %vm2435_vm0 }
 0x18b   :  { %735 = vst.msk [vmem:[#allocation2 + $0x10] sm:$0xff] %vm2470_vm12, %v1918_v12  ;;  %v1934_v35 = vmax.f32 %v1920_v9, %v413_v56  ;;  %v1937_v13 = vmax.f32 %v1922_v34, %v419_v40  ;;  %v1959_v9 = vld [vmem:[#allocation2 + $0x48] sm:$0xff]  ;;  %vm2491_vm12 = vmmov %vm2435_vm0 }
 0x18c   :  { %2478 = vst [vmem:[#allocation18_spill] sm:$0xff] %v1959_v9 }
 0x18d   :  { %2471 = vst [vmem:[#allocation12_spill] sm:$0xff] %v1934_v35  ;;  %2472 = vst [vmem:[#allocation13_spill] sm:$0xff] %v1937_v13  ;;  %510 = vperm.xlu0 %1248, %v1934_v35   ;;  %560 = vperm.xlu1 %1247, %v1915_v39  }
 0x18e   :  { %733 = vst.msk [vmem:[#allocation2] sm:$0xff] %vm2475_vm5, %v1934_v35  ;;  %v429_v56 = vpop.xlane.xlu0 %428  ;;  %v435_v40 = vpop.xlane.xlu1 %434  ;;  %v1981_v35 = vld [vmem:[#allocation2 + $0x38] sm:$0xff]  ;;  %vm2492_vm5 = vmmov %vm2435_vm0 }
 0x18f   :  { %736 = vst.msk [vmem:[#allocation2 + $0x18] sm:$0xff] %vm2435_vm0, %v1937_v13  ;;  %v1954_v12 = vmax.f32 %v1939_v32, %v429_v56  ;;  %v1957_v45 = vmax.f32 %v1941_v19, %v435_v40  ;;  %v1979_v32 = vld [vmem:[#allocation2 + $0x30] sm:$0xff]  ;;  %2485 = vst [vmem:[#allocation23_spill] sm:$0xff] %v1981_v35  ;;  %v2001_v19 = vld [vmem:[#allocation2 + $0x78] sm:$0xff] }
 0x190   :  { %2484 = vst [vmem:[#allocation22_spill] sm:$0xff] %v1979_v32  ;;  %2490 = vst [vmem:[#allocation26_spill] sm:$0xff] %v2001_v19 }
 0x191   :  { %2476 = vst [vmem:[#allocation16_spill] sm:$0xff] %v1954_v12  ;;  %2477 = vst [vmem:[#allocation17_spill] sm:$0xff] %v1957_v45  ;;  %565 = vperm.xlu0 %1248, %v1957_v45   ;;  %550 = vperm.xlu1 %1247, %v1954_v12  }
 0x192   :  { %741 = vst.msk [vmem:[#allocation2 + $0x40] sm:$0xff] %vm2480_vm11, %v1954_v12  ;;  %v431_v56 = vpop.xlane.xlu1 %430  ;;  %v415_v40 = vpop.xlane.xlu0 %414  ;;  %v2018_v12 = vld [vmem:[#allocation2 + $0x20] sm:$0xff]  ;;  %vm2494_vm11 = vmmov %vm2435_vm0 }
 0x193   :  { %744 = vst.msk [vmem:[#allocation2 + $0x58] sm:$0xff] %vm2481_vm15, %v1957_v45  ;;  %v1974_v39 = vmax.f32 %v1959_v9, %v431_v56  ;;  %v1977_v18 = vmax.f32 %v1961_v33, %v415_v40  ;;  %v1999_v9 = vld [vmem:[#allocation2 + $0x70] sm:$0xff]  ;;  %vm2496_vm15 = vmmov %vm2435_vm0 }
 0x194   :  { %2489 = vst [vmem:[#allocation25_spill] sm:$0xff] %v1999_v9 }
 0x195   :  { %2482 = vst [vmem:[#allocation20_spill] sm:$0xff] %v1974_v39  ;;  %2483 = vst [vmem:[#allocation21_spill] sm:$0xff] %v1977_v18  ;;  %555 = vperm.xlu0 %1248, %v1974_v39   ;;  %525 = vperm.xlu1 %1247, %v1937_v13  }
 0x196   :  { %742 = vst.msk [vmem:[#allocation2 + $0x48] sm:$0xff] %vm2486_vm13, %v1974_v39  ;;  %v425_v56 = vpop.xlane.xlu0 %424  ;;  %v427_v40 = vpop.xlane.xlu1 %426  ;;  %vm2497_vm13 = vmmov %vm2435_vm0 }
 0x197   :  { %734 = vst.msk [vmem:[#allocation2 + $0x8] sm:$0xff] %vm2487_vm6, %v1977_v18  ;;  %v1994_v45 = vmax.f32 %v1979_v32, %v425_v56  ;;  %v1997_v34 = vmax.f32 %v1981_v35, %v427_v40  ;;  %v2020_v32 = vld [vmem:[#allocation2 + $0x28] sm:$0xff]  ;;  %vm2498_vm6 = vmmov %vm2435_vm0  ;;  %v2500_v35 = vsel %vm1539_vm10, %v1561_v10, 0.0  ;;  %v759_v10 = vld [vmem:[%s2342_s2 + $0x50] sm:$0xff] }
 0x199   :  { %2488 = vst [vmem:[#allocation24_spill] sm:$0xff] %v1994_v45  ;;  %739 = vst.msk [vmem:[#allocation2 + $0x30] sm:$0xff] %vm2491_vm12, %v1994_v45  ;;  %515 = vperm.xlu1 %1247, %v1977_v18  }
 0x19a   :  { %740 = vst.msk [vmem:[#allocation2 + $0x38] sm:$0xff] %vm2492_vm5, %v1997_v34  ;;  %v441_v56 = vpop.xlane.xlu0 %440  ;;  %v443_v40 = vpop.xlane.xlu1 %442  ;;  %vm2499_vm12 = vmmov %vm2435_vm0  ;;  %vm2501_vm5 = vnez %v2388_v60 }
 0x19b   :  { %v2013_v33 = vmax.f32 %v1999_v9, %v441_v56  ;;  %v2016_v13 = vmax.f32 %v2001_v19, %v443_v40  ;;  %v2038_v9 = vld [vmem:[#allocation2 + $0x60] sm:$0xff] }
 0x19d   :  { %2493 = vst [vmem:[#allocation27_spill] sm:$0xff] %v2016_v13  ;;  %747 = vst.msk [vmem:[#allocation2 + $0x70] sm:$0xff] %vm2435_vm0, %v2013_v33  ;;  %585 = vperm.xlu0 %1248, %v2016_v13   ;;  %540 = vperm.xlu1 %1247, %v1994_v45   ;;  %v2502_v45 = vsel %vm2501_vm5, %v1544_v3, 0.0  ;;  %vm826_vm0 = vcmp.eq.s32.totalorder %v1906_v8, %v1482_v42  ;;  %v2505_v3 = vsel %vm1573_vm14, %v1602_v23, 0.0  ;;  %v763_v23 = vld [vmem:[%s2342_s2 + $0x70] sm:$0xff]  ;;  %vm2510_vm14 = vnez %v2404_v27 }
 0x19e   :  { %748 = vst.msk [vmem:[#allocation2 + $0x78] sm:$0xff] %vm2494_vm11, %v2016_v13  ;;  %v421_v56 = vpop.xlane.xlu0 %420  ;;  %v423_v40 = vpop.xlane.xlu1 %422  ;;  %vm842_vm10 = vmand %vm826_vm0, %vm1704_vm9  ;;  %v2511_v20 = vsel %vm2510_vm14, %v1608_v25, 0.0 }
 0x19f   :  { %v2033_v18 = vmax.f32 %v2018_v12, %v421_v56  ;;  %v2036_v39 = vmax.f32 %v2020_v32, %v423_v40  ;;  %v874_v60 = vsel %vm842_vm10, %v1563_v11, 0.0  ;;  %v761_v11 = vld [vmem:[%s2342_s2 + $0x60] sm:$0xff]  ;;  %vm2514_vm9 = vmmov %vm2498_vm6 }
 0x1a0   :  { %vm2515_vm11 = vmmov %vm2498_vm6 }
 0x1a1   :  { %737 = vst.msk [vmem:[#allocation2 + $0x20] sm:$0xff] %vm2496_vm15, %v2033_v18  ;;  %580 = vperm.xlu1 %1247, %v2013_v33   ;;  %vm2516_vm15 = vmmov %vm2498_vm6 }
 0x1a2   :  { %738 = vst.msk [vmem:[#allocation2 + $0x28] sm:$0xff] %vm2497_vm13, %v2036_v39  ;;  %v437_v56 = vpop.xlane.xlu0 %436  ;;  %v439_v40 = vpop.xlane.xlu1 %438  ;;  %vm2517_vm13 = vmmov %vm2498_vm6 }
 0x1a3   :  { %v2052_v13 = vmax.f32 %v2038_v9, %v437_v56  ;;  %v2055_v19 = vmax.f32 %v2040_v58, %v439_v40  ;;  %v762_v56 = vld [vmem:[%s2342_s2 + $0x68] sm:$0xff]  ;;  %v764_v40 = vld [vmem:[%s2342_s2 + $0x78] sm:$0xff]  ;;  %v2503_v58 = vsel %vm1678_vm8, %v1688_v50, 0.0  ;;  %vm2512_vm8 = vnez %v2422_v54  ;;  %vm2519_vm5 = vmmov %vm2498_vm6 }
 0x1a4   :  { %vm845_vm4 = vmand %vm829_vm3, %vm2512_vm8 }
 0x1a5   :  { %745 = vst.msk [vmem:[#allocation2 + $0x60] sm:$0xff] %vm2498_vm6, %v2052_v13  ;;  %530 = vperm.xlu1 %1247, %v2033_v18   ;;  %vm2520_vm0 = vmmov %vm2519_vm5 }
 0x1a6   :  { %746 = vst.msk [vmem:[#allocation2 + $0x68] sm:$0xff] %vm2499_vm12, %v2055_v19  ;;  %vm2518_vm12 = vmmov %vm2498_vm6 }
 0x1a7   :  { %vm2521_vm10 = vmmov %vm2520_vm0 }
 0x1a8   :  { %vm2522_vm7 = vmmov %vm2520_vm0 }
 0x1a9   :  { %570 = vperm.xlu1 %1247, %v2052_v13   ;;  %vm2523_vm14 = vmmov %vm2520_vm0 }
 0x1aa   :  { %vm2524_vm3 = vmmov %vm2520_vm0 }
 0x1ab   :  { %vm2525_vm8 = vmmov %vm2520_vm0 }
 0x1ad   :  { %545 = vperm.xlu1 %1247, %v1997_v34  }
 0x1b1   :  { %535 = vperm.xlu1 %1247, %v2036_v39  }
 0x1b5   :  { %806 = vperm.xlu1 %1247, %v762_v56  }
 0x1b9   :  { %812 = vperm.xlu1 %1247, %v764_v40  }
 0x1bc   :  { %882 = vadd.xlane.f32.xlu0 %v2500_v35 }
 0x1c0   :  { %886 = vadd.xlane.f32.xlu0 %v2502_v45 }
 0x1c4   :  { %890 = vadd.xlane.f32.xlu0 %v2503_v58 }
 0x1c8   :  { %894 = vadd.xlane.f32.xlu0 %v2504_v2 }
 0x1cc   :  { %898 = vadd.xlane.f32.xlu0 %v874_v60 }
 0x1dd   :  { %884 = vadd.xlane.f32.xlu1 %v2505_v3 }
 0x1e1   :  { %888 = vadd.xlane.f32.xlu1 %v2506_v38 }
 0x1e2   :  { %797 = vperm.xlu0 %1248, %v759_v10  }
 0x1e5   :  { %892 = vadd.xlane.f32.xlu1 %v2507_v14 }
 0x1e6   :  { %803 = vperm.xlu0 %1248, %v761_v11  }
 0x1e9   :  { %896 = vadd.xlane.f32.xlu1 %v2509_v15 }
 0x1ea   :  { %809 = vperm.xlu0 %1248, %v763_v23  }
 0x1ed   :  { %900 = vadd.xlane.f32.xlu1 %v2511_v20 }
 0x1ee   :  { %575 = vperm.xlu0 %1248, %v2055_v19  }
 0x208   :  { %v521_v47 = vpop.permute.xlu1 %520 }
 0x209   :  { %v590_v48 = vsub.f32 %v1612_v26, %v521_v47 }
 0x20b   :  { %v608_v50 = vmul.f32 1.442695, %v590_v48 }
 0x20c   :  { %v511_v45 = vpop.permute.xlu0 %510  ;;  %v561_v52 = vpop.permute.xlu1 %560 }
 0x20d   :  { %1265 = vpow2.f32 %v608_v50  ;;  %v588_v53 = vsub.f32 %v1667_v43, %v511_v45  ;;  %v598_v55 = vsub.f32 %v1606_v24, %v561_v52  ;;  %v2513_v52 = vmov 0.0  }
 0x20e   :  { %1144 = vst.msk [vmem:[%s2345_s6 + $0x10] sm:$0xff] %vm2514_vm9, %v2513_v52 }
 0x20f   :  { %v604_v58 = vmul.f32 1.442695, %v588_v53  ;;  %v624_v35 = vmul.f32 1.442695, %v598_v55  ;;  %1145 = vst.msk [vmem:[%s2345_s6 + $0x18] sm:$0xff] %vm2515_vm11, %v2513_v52 }
 0x210   :  { %v566_v59 = vpop.permute.xlu0 %565  ;;  %v551_v27 = vpop.permute.xlu1 %550  ;;  %1146 = vst.msk [vmem:[%s2345_s6 + $0x20] sm:$0xff] %vm2516_vm15, %v2513_v52  ;;  %vm2527_vm15 = vmmov %vm2520_vm0 }
 0x211   :  { %1267 = vpow2.f32 %v604_v58  ;;  %v599_v25 = vsub.f32 %v1738_v0, %v566_v59  ;;  %v596_v1 = vsub.f32 %v1734_v63, %v551_v27  ;;  %1147 = vst.msk [vmem:[%s2345_s6 + $0x28] sm:$0xff] %vm2517_vm13, %v2513_v52  ;;  %vm2529_vm13 = vmmov %vm2520_vm0 }
 0x212   :  { %1269 = vpow2.f32 %v624_v35  ;;  %1148 = vst.msk [vmem:[%s2345_s6 + $0x30] sm:$0xff] %vm2498_vm6, %v2513_v52  ;;  %vm2530_vm6 = vmmov %vm2520_vm0 }
 0x213   :  { %v626_v8 = vmul.f32 1.442695, %v599_v25  ;;  %v620_v26 = vmul.f32 1.442695, %v596_v1  ;;  %1149 = vst.msk [vmem:[%s2345_s6 + $0x38] sm:$0xff] %vm2518_vm12, %v2513_v52  ;;  %vm2531_vm12 = vmmov %vm2520_vm0 }
 0x214   :  { %v526_v56 = vpop.permute.xlu1 %525  ;;  %v556_v15 = vpop.permute.xlu0 %555  ;;  %1150 = vst.msk [vmem:[%s2345_s6 + $0x40] sm:$0xff] %vm2519_vm5, %v2513_v52 }
 0x215   :  { %1271 = vpow2.f32 %v626_v8  ;;  %v591_v40 = vsub.f32 %v1671_v44, %v526_v56  ;;  %v597_v47 = vsub.f32 %v1760_v22, %v556_v15  ;;  %1151 = vst.msk [vmem:[%s2345_s6 + $0x48] sm:$0xff] %vm2520_vm0, %v2513_v52  ;;  %v850_v8 = vld [vmem:[#allocation4] sm:$0xff]  ;;  %v852_v56 = vld [vmem:[#allocation4 + $0x10] sm:$0xff] }
 0x216   :  { %1273 = vpow2.f32 %v620_v26  ;;  %1152 = vst.msk [vmem:[%s2345_s6 + $0x50] sm:$0xff] %vm2521_vm10, %v2513_v52 }
 0x217   :  { %v1266_v43 = vpop.eup %1265  ;;  %v610_v2 = vmul.f32 1.442695, %v591_v40  ;;  %v622_v50 = vmul.f32 1.442695, %v597_v47  ;;  %1153 = vst.msk [vmem:[%s2345_s6 + $0x58] sm:$0xff] %vm2522_vm7, %v2513_v52  ;;  %v854_v40 = vld [vmem:[#allocation4 + $0x20] sm:$0xff] }
 0x218   :  { %672 = vadd.xlane.f32.xlu0 %v1266_v43  ;;  %v516_v24 = vpop.permute.xlu1 %515  ;;  %1154 = vst.msk [vmem:[%s2345_s6 + $0x60] sm:$0xff] %vm2523_vm14, %v2513_v52 }
 0x219   :  { %v589_v60 = vsub.f32 %v1764_v28, %v516_v24  ;;  %1275 = vpow2.f32 %v610_v2  ;;  %v877_v28 = vsel %vm845_vm4, %v1580_v16, 0.0  ;;  %1155 = vst.msk [vmem:[%s2345_s6 + $0x68] sm:$0xff] %vm2524_vm3, %v2513_v52  ;;  %vm2526_vm4 = vmmov %vm2520_vm0  ;;  %v856_v24 = vld [vmem:[#allocation4 + $0x30] sm:$0xff] }
 0x21a   :  { %1156 = vst.msk [vmem:[%s2345_s6 + $0x70] sm:$0xff] %vm2525_vm8, %v2513_v52 }
 0x21b   :  { %v1268_v3 = vpop.eup %1267  ;;  %v606_v10 = vmul.f32 1.442695, %v589_v60  ;;  %1157 = vst.msk [vmem:[%s2345_s6 + $0x78] sm:$0xff] %vm2526_vm4, %v2513_v52  ;;  %v853_v52 = vld [vmem:[#allocation4 + $0x18] sm:$0xff] }
 0x21c   :  { %v1270_v0 = vpop.eup %1269  ;;  %668 = vadd.xlane.f32.xlu1 %v1268_v3  ;;  %v2131_v63 = vpop.permute.xlu1 %540 }
 0x21d   :  { %1277 = vpow2.f32 %v606_v10  ;;  %688 = vadd.xlane.f32.xlu0 %v1270_v0  ;;  %v586_v45 = vpop.permute.xlu0 %585  ;;  %v858_v10 = vld [vmem:[#allocation4 + $0x40] sm:$0xff] }
 0x21e   :  { %1279 = vpow2.f32 %v622_v50  ;;  %v603_v22 = vsub.f32 %v1804_v30, %v586_v45 }
 0x21f   :  { %v1272_v44 = vpop.eup %1271 }
 0x220   :  { %v1274_v38 = vpop.eup %1273  ;;  %690 = vadd.xlane.f32.xlu1 %v1272_v44  ;;  %v2135_v11 = vpop.permute.xlu1 %580  ;;  %v634_v55 = vmul.f32 1.442695, %v603_v22  ;;  %v594_v44 = vsub.f32 %v1776_v62, %v2131_v63 }
 0x221   :  { %684 = vadd.xlane.f32.xlu0 %v1274_v38 }
 0x223   :  { %v1276_v14 = vpop.eup %1275 }
 0x224   :  { %904 = vadd.xlane.f32.xlu1 %v877_v28  ;;  %v2140_v23 = vpop.permute.xlu1 %530  ;;  %v616_v28 = vmul.f32 1.442695, %v594_v44 }
 0x225   :  { %674 = vadd.xlane.f32.xlu0 %v1276_v14  ;;  %v602_v14 = vsub.f32 %v1800_v21, %v2135_v11  ;;  %v592_v47 = vsub.f32 %v1816_v41, %v2140_v23  ;;  %v851_v23 = vld [vmem:[#allocation4 + $0x8] sm:$0xff] }
 0x227   :  { %v1278_v31 = vpop.eup %1277 }
 0x228   :  { %v2142_v20 = vpop.permute.xlu1 %570  ;;  %v1280_v27 = vpop.eup %1279 }
 0x229   :  { %670 = vadd.xlane.f32.xlu0 %v1278_v31  ;;  %v632_v31 = vmul.f32 1.442695, %v602_v14  ;;  %v600_v21 = vsub.f32 %v1898_v29, %v2142_v20  ;;  %v2554_v14 = vld [vmem:[#allocation16_spill] sm:$0xff] }
 0x22c   :  { %v546_v48 = vpop.permute.xlu1 %545 }
 0x22d   :  { %v595_v54 = vsub.f32 %v1780_v57, %v546_v48  ;;  %v612_v48 = vmul.f32 1.442695, %v592_v47  ;;  %v2556_v47 = vld [vmem:[#allocation11_spill] sm:$0xff] }
 0x22f   :  { %v618_v57 = vmul.f32 1.442695, %v595_v54 }
 0x230   :  { %v536_v16 = vpop.permute.xlu1 %535 }
 0x231   :  { %1281 = vpow2.f32 %v618_v57  ;;  %v593_v58 = vsub.f32 %v1820_v6, %v536_v16  ;;  %v855_v57 = vld [vmem:[#allocation4 + $0x28] sm:$0xff] }
 0x232   :  { %1283 = vpow2.f32 %v634_v55 }
 0x233   :  { %v614_v59 = vmul.f32 1.442695, %v593_v58 }
 0x234   :  { %v807_v53 = vpop.permute.xlu1 %806 }
 0x235   :  { %vm831_vm9 = vcmp.eq.s32.totalorder %v807_v53, %v1482_v42  ;;  %1285 = vpow2.f32 %v614_v59 }
 0x236   :  { %vm847_vm11 = vmand %vm831_vm9, %vm1828_vm2  ;;  %1287 = vpow2.f32 %v616_v28  ;;  %v2553_v28 = vld [vmem:[#allocation14_spill] sm:$0xff] }
 0x237   :  { %v879_v35 = vsel %vm847_vm11, %v1742_v46, 0.0  ;;  %vm2528_vm2 = vmmov %vm2520_vm0  ;;  %vm2532_vm0 = vnez %v2394_v5  ;;  %1289 = vpow2.f32 %v632_v31  ;;  %vm2537_vm11 = vnez %v2428_v61  ;;  %v2542_v61 = vld [vmem:[#allocation9_spill] sm:$0xff] }
 0x238   :  { %908 = vadd.xlane.f32.xlu1 %v879_v35  ;;  %v813_v11 = vpop.permute.xlu1 %812  ;;  %1291 = vpow2.f32 %v612_v48  ;;  %vm2533_vm3 = vmmov %vm2528_vm2  ;;  %v857_v35 = vld [vmem:[#allocation4 + $0x38] sm:$0xff] }
 0x23b   :  { %v1282_v30 = vpop.eup %1281 }
 0x23c   :  { %686 = vadd.xlane.f32.xlu1 %v1280_v27  ;;  %v1284_v25 = vpop.eup %1283 }
 0x23f   :  { %v1286_v1 = vpop.eup %1285 }
 0x240   :  { %682 = vadd.xlane.f32.xlu1 %v1282_v30  ;;  %v1288_v45 = vpop.eup %1287  ;;  %v859_v30 = vld [vmem:[#allocation4 + $0x48] sm:$0xff] }
 0x241   :  { %v1290_v22 = vpop.eup %1289 }
 0x242   :  { %v1292_v58 = vpop.eup %1291 }
 0x244   :  { %698 = vadd.xlane.f32.xlu1 %v1284_v25 }
 0x248   :  { %678 = vadd.xlane.f32.xlu1 %v1286_v1 }
 0x249   :  { %v883_v6 = vpop.xlane.xlu0 %882 }
 0x24a   :  { %v914_v26 = vadd.f32 %v883_v6, %v850_v8 }
 0x24c   :  { %930 = vst.msk [vmem:[#allocation4] sm:$0xff] %vm2527_vm15, %v914_v26  ;;  %v2540_v26 = vld [vmem:[#allocation5_spill] sm:$0xff] }
 0x24d   :  { %v887_v17 = vpop.xlane.xlu0 %886 }
 0x24e   :  { %v916_v46 = vadd.f32 %v887_v17, %v852_v56  ;;  %v2541_v17 = vld [vmem:[#allocation7_spill] sm:$0xff] }
 0x250   :  { %932 = vst.msk [vmem:[#allocation4 + $0x10] sm:$0xff] %vm2528_vm2, %v916_v46  ;;  %v2543_v46 = vsub.f32 %v2541_v17, %v2542_v61  ;;  %v861_v17 = vld [vmem:[#allocation4 + $0x58] sm:$0xff] }
 0x251   :  { %v891_v43 = vpop.xlane.xlu0 %890 }
 0x252   :  { %v918_v2 = vadd.f32 %v891_v43, %v854_v40  ;;  %v480_v40 = vmul.f32 1.442695, %v2543_v46  ;;  %v2545_v43 = vld [vmem:[#allocation12_spill] sm:$0xff] }
 0x254   :  { %934 = vst.msk [vmem:[#allocation4 + $0x20] sm:$0xff] %vm2529_vm13, %v918_v2 }
 0x255   :  { %v895_v60 = vpop.xlane.xlu0 %894 }
 0x256   :  { %v920_v3 = vadd.f32 %v895_v60, %v856_v24  ;;  %v2548_v60 = vld [vmem:[#allocation8_spill] sm:$0xff] }
 0x258   :  { %936 = vst.msk [vmem:[#allocation4 + $0x30] sm:$0xff] %vm2530_vm6, %v920_v3  ;;  %vm2539_vm6 = vnez %v2430_v7  ;;  %v2551_v7 = vld [vmem:[#allocation17_spill] sm:$0xff] }
 0x259   :  { %v899_v0 = vpop.xlane.xlu0 %898 }
 0x25a   :  { %v922_v38 = vadd.f32 %v899_v0, %v858_v10  ;;  %v2550_v0 = vld [vmem:[#allocation15_spill] sm:$0xff] }
 0x25b   :  { %v2552_v44 = vsub.f32 %v2550_v0, %v2551_v7  ;;  %v2570_v0 = vld [vmem:[#allocation20_spill] sm:$0xff] }
 0x25c   :  { %938 = vst.msk [vmem:[#allocation4 + $0x40] sm:$0xff] %vm2531_vm12, %v922_v38 }
 0x25d   :  { %v498_v38 = vmul.f32 1.442695, %v2552_v44 }
 0x261   :  { %v798_v15 = vpop.permute.xlu0 %797 }
 0x262   :  { %vm828_vm5 = vcmp.eq.s32.totalorder %v798_v15, %v1482_v42  ;;  %v2555_v15 = vsub.f32 %v2553_v28, %v2554_v14  ;;  %v2573_v28 = vld [vmem:[#allocation23_spill] sm:$0xff] }
 0x263   :  { %vm844_vm10 = vmand %vm828_vm5, %vm2532_vm0  ;;  %v2574_v14 = vsub.f32 %v2573_v28, %v1997_v34  ;;  %v2578_v34 = vsub.f32 %v2020_v32, %v2036_v39  ;;  %v860_v28 = vld [vmem:[#allocation4 + $0x50] sm:$0xff] }
 0x264   :  { %v876_v62 = vsel %vm844_vm10, %v1546_v4, 0.0  ;;  %v628_v4 = vmul.f32 1.442695, %v600_v21  ;;  %v492_v31 = vmul.f32 1.442695, %v2555_v15 }
 0x265   :  { %v804_v63 = vpop.permute.xlu0 %803  ;;  %902 = vadd.xlane.f32.xlu0 %v876_v62  ;;  %v2557_v62 = vld [vmem:[#allocation13_spill] sm:$0xff]  ;;  %v490_v15 = vmul.f32 1.442695, %v2574_v14 }
 0x266   :  { %vm830_vm7 = vcmp.eq.s32.totalorder %v804_v63, %v1482_v42  ;;  %1293 = vpow2.f32 %v628_v4  ;;  %v2558_v63 = vsub.f32 %v2556_v47, %v2557_v62  ;;  %v1062_v47 = vld [vmem:[%s2346_s5] sm:$0xff] }
 0x267   :  { %vm846_vm14 = vmand %vm830_vm7, %vm1824_vm1  ;;  %v1046_v62 = vld [vmem:[#allocation4] sm:$0xff] }
 0x268   :  { %v878_v41 = vsel %vm846_vm14, %v1690_v51, 0.0  ;;  %vm2534_vm1 = vmmov %vm2528_vm2  ;;  %vm833_vm2 = vcmp.eq.s32.totalorder %v813_v11, %v1482_v42  ;;  %v482_v48 = vmul.f32 1.442695, %v2558_v63  ;;  %v638_v11 = vld [vmem:[#allocation3 + $0x10] sm:$0xff]  ;;  %v2575_v63 = vld [vmem:[#allocation26_spill] sm:$0xff] }
 0x269   :  { %v810_v5 = vpop.permute.xlu0 %809  ;;  %906 = vadd.xlane.f32.xlu0 %v878_v41  ;;  %vm2535_vm8 = vmmov %vm2534_vm1  ;;  %v2559_v41 = vld [vmem:[#allocation19_spill] sm:$0xff] }
 0x26a   :  { %v885_v50 = vpop.xlane.xlu1 %884  ;;  %vm832_vm4 = vcmp.eq.s32.totalorder %v810_v5, %v1482_v42  ;;  %vm2536_vm9 = vmmov %vm2534_vm1  ;;  %v2544_v42 = vld [vmem:[#allocation10_spill] sm:$0xff] }
 0x26b   :  { %v915_v54 = vadd.f32 %v885_v50, %v851_v23  ;;  %vm848_vm15 = vmand %vm832_vm4, %vm2537_vm11  ;;  %v2546_v2 = vsub.f32 %v2544_v42, %v2545_v43  ;;  %v2560_v23 = vld [vmem:[#allocation21_spill] sm:$0xff] }
 0x26c   :  { %v880_v6 = vsel %vm848_vm15, %v1686_v49, 0.0  ;;  %vm2538_vm13 = vmmov %vm2534_vm1  ;;  %v2547_v49 = vld [vmem:[#allocation6_spill] sm:$0xff]  ;;  %v2561_v5 = vsub.f32 %v2559_v41, %v2560_v23  ;;  %v966_v23 = vld [vmem:[#allocation2] sm:$0xff] }
 0x26d   :  { %931 = vst.msk [vmem:[#allocation4 + $0x8] sm:$0xff] %vm2533_vm3, %v915_v54  ;;  %v576_v29 = vpop.permute.xlu0 %575  ;;  %680 = vadd.xlane.f32.xlu0 %v1288_v45  ;;  %vm849_vm12 = vmand %vm833_vm2, %vm2539_vm6  ;;  %v476_v24 = vmul.f32 1.442695, %v2546_v2  ;;  %v2549_v3 = vsub.f32 %v2547_v49, %v2548_v60  ;;  %v637_v2 = vld [vmem:[#allocation3 + $0x8] sm:$0xff] }
 0x26e   :  { %v601_v20 = vsub.f32 %v1902_v37, %v576_v29  ;;  %v889_v36 = vpop.xlane.xlu1 %888  ;;  %v881_v56 = vsel %vm849_vm12, %v2540_v26, 0.0  ;;  %v478_v4 = vmul.f32 1.442695, %v2561_v5  ;;  %vm2562_vm5 = vmmov %vm2534_vm1  ;;  %v639_v26 = vld [vmem:[#allocation3 + $0x18] sm:$0xff] }
 0x26f   :  { %v917_v16 = vadd.f32 %v889_v36, %v853_v52  ;;  %v496_v10 = vmul.f32 1.442695, %v2549_v3  ;;  %v636_v52 = vld [vmem:[#allocation3] sm:$0xff]  ;;  %v646_v36 = vld [vmem:[#allocation3 + $0x50] sm:$0xff]  ;;  %vm2563_vm0 = vmmov %vm2534_vm1 }
 0x270   :  { %v630_v51 = vmul.f32 1.442695, %v601_v20  ;;  %v1294_v27 = vpop.eup %1293  ;;  %vm2564_vm10 = vmmov %vm2563_vm0 }
 0x271   :  { %933 = vst.msk [vmem:[#allocation4 + $0x18] sm:$0xff] %vm2534_vm1, %v917_v16  ;;  %696 = vadd.xlane.f32.xlu0 %v1290_v22  ;;  %vm2565_vm7 = vmmov %vm2563_vm0 }
 0x272   :  { %1295 = vpow2.f32 %v630_v51  ;;  %v893_v53 = vpop.xlane.xlu1 %892  ;;  %vm2566_vm14 = vmmov %vm2563_vm0 }
 0x273   :  { %v919_v55 = vadd.f32 %v893_v53, %v855_v57  ;;  %1297 = vpow2.f32 %v480_v40  ;;  %v647_v53 = vld [vmem:[#allocation3 + $0x58] sm:$0xff]  ;;  %vm2567_vm3 = vmmov %vm2563_vm0 }
 0x274   :  { %1299 = vpow2.f32 %v476_v24  ;;  %vm2568_vm1 = vmmov %vm2563_vm0 }
 0x275   :  { %935 = vst.msk [vmem:[#allocation4 + $0x28] sm:$0xff] %vm2535_vm8, %v919_v55  ;;  %676 = vadd.xlane.f32.xlu0 %v1292_v58  ;;  %1301 = vpow2.f32 %v496_v10  ;;  %v2569_v10 = vld [vmem:[#allocation18_spill] sm:$0xff]  ;;  %vm2572_vm8 = vmmov %vm2563_vm0 }
 0x276   :  { %v897_v59 = vpop.xlane.xlu1 %896  ;;  %1303 = vpow2.f32 %v498_v38  ;;  %v2571_v7 = vsub.f32 %v2569_v10, %v2570_v0  ;;  %vm2579_vm4 = vmmov %vm2563_vm0  ;;  %v2589_v10 = vld [vmem:[#allocation25_spill] sm:$0xff] }
 0x277   :  { %v921_v37 = vadd.f32 %v897_v59, %v857_v35  ;;  %1305 = vpow2.f32 %v492_v31  ;;  %v644_v59 = vld [vmem:[#allocation3 + $0x40] sm:$0xff]  ;;  %vm2581_vm11 = vmmov %vm2563_vm0  ;;  %v2590_v0 = vsub.f32 %v2589_v10, %v2013_v33 }
 0x278   :  { %1307 = vpow2.f32 %v482_v48  ;;  %v494_v44 = vmul.f32 1.442695, %v2571_v7  ;;  %v2576_v48 = vld [vmem:[#allocation27_spill] sm:$0xff]  ;;  %vm2582_vm15 = vmmov %vm2563_vm0 }
 0x279   :  { %937 = vst.msk [vmem:[#allocation4 + $0x38] sm:$0xff] %vm2536_vm9, %v921_v37  ;;  %692 = vadd.xlane.f32.xlu0 %v1294_v27  ;;  %1309 = vpow2.f32 %v478_v4  ;;  %v1078_v4 = vmul.f32 %v1062_v47, %v1046_v62  ;;  %vm2580_vm9 = vmmov %vm2563_vm0  ;;  %v504_v7 = vmul.f32 1.442695, %v2590_v0  ;;  %v2593_v62 = vld [vmem:[#allocation28_spill] sm:$0xff] }
 0x27a   :  { %v901_v25 = vpop.xlane.xlu1 %900  ;;  %vm2583_vm2 = vmmov %vm2563_vm0 }
 0x27b   :  { %v923_v1 = vadd.f32 %v901_v25, %v859_v30  ;;  %vm2585_vm6 = vmmov %vm2563_vm0 }
 0x27c   :  { %v1296_v8 = vpop.eup %1295  ;;  %vm2594_vm12 = vmmov %vm2563_vm0 }
 0x27d   :  { %939 = vst.msk [vmem:[#allocation4 + $0x48] sm:$0xff] %vm2538_vm13, %v923_v1  ;;  %910 = vadd.xlane.f32.xlu0 %v880_v6  ;;  %694 = vadd.xlane.f32.xlu1 %v1296_v8  ;;  %v1298_v21 = vpop.eup %1297  ;;  %vm2584_vm13 = vmmov %vm2563_vm0 }
 0x27e   :  { %v654_v50 = vmul.f32 %v1298_v21, %v638_v11  ;;  %v1300_v54 = vpop.eup %1299  ;;  %v2577_v21 = vsub.f32 %v2575_v63, %v2576_v48  ;;  %v473_v63 = vsub.f32 %v2593_v62, %v2055_v19  ;;  %v862_v48 = vld [vmem:[#allocation4 + $0x60] sm:$0xff] }
 0x27f   :  { %v1302_v29 = vpop.eup %1301  ;;  %v652_v16 = vmul.f32 %v1300_v54, %v636_v52  ;;  %v486_v54 = vmul.f32 1.442695, %v2578_v34  ;;  %v863_v52 = vld [vmem:[#allocation4 + $0x68] sm:$0xff]  ;;  %v640_v34 = vld [vmem:[#allocation3 + $0x20] sm:$0xff] }
 0x280   :  { %v1304_v22 = vpop.eup %1303  ;;  %v662_v51 = vmul.f32 %v1302_v29, %v646_v36  ;;  %v506_v11 = vmul.f32 1.442695, %v2577_v21  ;;  %v645_v36 = vld [vmem:[#allocation3 + $0x48] sm:$0xff] }
 0x281   :  { %912 = vadd.xlane.f32.xlu1 %v881_v56  ;;  %v1306_v55 = vpop.eup %1305  ;;  %v663_v27 = vmul.f32 %v1304_v22, %v647_v53  ;;  %v643_v53 = vld [vmem:[#allocation3 + $0x38] sm:$0xff] }
 0x282   :  { %v660_v30 = vmul.f32 %v1306_v55, %v644_v59  ;;  %v1308_v1 = vpop.eup %1307  ;;  %v1063_v55 = vld [vmem:[%s2346_s5 + $0x8] sm:$0xff] }
 0x283   :  { %v655_v61 = vmul.f32 %v1308_v1, %v639_v26  ;;  %v1310_v40 = vpop.eup %1309 }
 0x284   :  { %v653_v60 = vmul.f32 %v1310_v40, %v637_v2 }
 0x2a5   :  { %v673_v45 = vpop.xlane.xlu0 %672 }
 0x2a6   :  { %v702_v20 = vadd.f32 %v673_v45, %v654_v50 }
 0x2a8   :  { %719 = vst.msk [vmem:[#allocation3 + $0x10] sm:$0xff] %vm2562_vm5, %v702_v20  ;;  %vm2595_vm5 = vmmov %vm2563_vm0 }
 0x2a9   :  { %v669_v57 = vpop.xlane.xlu1 %668 }
 0x2aa   :  { %v689_v58 = vpop.xlane.xlu0 %688  ;;  %v700_v35 = vadd.f32 %v669_v57, %v652_v16 }
 0x2ab   :  { %v710_v37 = vadd.f32 %v689_v58, %v662_v51  ;;  %v1047_v58 = vld [vmem:[#allocation4 + $0x8] sm:$0xff] }
 0x2ac   :  { %717 = vst.msk [vmem:[#allocation3] sm:$0xff] %vm2563_vm0, %v700_v35  ;;  %v1079_v1 = vmul.f32 %v1063_v55, %v1047_v58 }
 0x2ad   :  { %727 = vst.msk [vmem:[#allocation3 + $0x50] sm:$0xff] %vm2564_vm10, %v710_v37  ;;  %v691_v25 = vpop.xlane.xlu1 %690  ;;  %vm2596_vm10 = vmmov %vm2563_vm0 }
 0x2ae   :  { %v685_v8 = vpop.xlane.xlu0 %684  ;;  %v711_v6 = vadd.f32 %v691_v25, %v663_v27  ;;  %v967_v27 = vld [vmem:[#allocation2 + $0x8] sm:$0xff]  ;;  %v651_v25 = vld [vmem:[#allocation3 + $0x78] sm:$0xff] }
 0x2af   :  { %v708_v56 = vadd.f32 %v685_v8, %v660_v30 }
 0x2b0   :  { %728 = vst.msk [vmem:[#allocation3 + $0x58] sm:$0xff] %vm2565_vm7, %v711_v6  ;;  %vm2597_vm7 = vmmov %vm2563_vm0 }
 0x2b1   :  { %725 = vst.msk [vmem:[#allocation3 + $0x40] sm:$0xff] %vm2566_vm14, %v708_v56  ;;  %v905_v46 = vpop.xlane.xlu1 %904  ;;  %vm2598_vm14 = vmmov %vm2563_vm0 }
 0x2b2   :  { %v675_v42 = vpop.xlane.xlu0 %674  ;;  %v925_v43 = vadd.f32 %v905_v46, %v861_v17  ;;  %v641_v46 = vld [vmem:[#allocation3 + $0x28] sm:$0xff] }
 0x2b3   :  { %v982_v24 = vld [vmem:[#allocation3] sm:$0xff]  ;;  %v703_v49 = vadd.f32 %v675_v42, %v655_v61 }
 0x2b4   :  { %1311 = vlog2.f32 %v982_v24  ;;  %941 = vst.msk [vmem:[#allocation4 + $0x58] sm:$0xff] %vm2567_vm3, %v925_v43  ;;  %v2586_v24 = vld [vmem:[#allocation22_spill] sm:$0xff]  ;;  %vm2599_vm3 = vmmov %vm2563_vm0 }
 0x2b5   :  { %720 = vst.msk [vmem:[#allocation3 + $0x18] sm:$0xff] %vm2568_vm1, %v703_v49  ;;  %1313 = vpow2.f32 %v494_v44  ;;  %v2587_v49 = vld [vmem:[#allocation24_spill] sm:$0xff]  ;;  %v2591_v44 = vsub.f32 %v2018_v12, %v2033_v18  ;;  %v502_v18 = vmul.f32 1.442695, %v473_v63  ;;  %vm2600_vm1 = vmmov %vm2563_vm0 }
 0x2b6   :  { %v671_v3 = vpop.xlane.xlu0 %670  ;;  %1315 = vpow2.f32 %v490_v15 }
 0x2b7   :  { %v701_v38 = vadd.f32 %v671_v3, %v653_v60  ;;  %v2588_v60 = vsub.f32 %v2586_v24, %v2587_v49 }
 0x2b9   :  { %718 = vst.msk [vmem:[#allocation3 + $0x8] sm:$0xff] %vm2572_vm8, %v701_v38  ;;  %v488_v3 = vmul.f32 1.442695, %v2588_v60  ;;  %v484_v38 = vmul.f32 1.442695, %v2591_v44  ;;  %vm2601_vm8 = vmmov %vm2563_vm0 }
 0x2be   :  { %v1312_v31 = vpop.eup %1311 }
 0x2bf   :  { %v999_v41 = vmul.f32 0.6931472, %v1312_v31  ;;  %v1314_v29 = vpop.eup %1313  ;;  %v2592_v31 = vsub.f32 %v2038_v9, %v2052_v13 }
 0x2c0   :  { %v983_v5 = vld [vmem:[#allocation3 + $0x8] sm:$0xff]  ;;  %v661_v22 = vmul.f32 %v1314_v29, %v645_v36  ;;  %v1316_v51 = vpop.eup %1315 }
 0x2c1   :  { %v1030_v50 = vadd.f32 %v999_v41, %v966_v23  ;;  %1317 = vlog2.f32 %v983_v5  ;;  %v659_v59 = vmul.f32 %v1316_v51, %v643_v53  ;;  %v500_v47 = vmul.f32 1.442695, %v2592_v31 }
 0x2c2   :  { %1319 = vpow2.f32 %v506_v11  ;;  %v642_v11 = vld [vmem:[#allocation3 + $0x30] sm:$0xff] }
 0x2c3   :  { %v1094_v45 = vsub.f32 %v1030_v50, %v1078_v4  ;;  %1321 = vpow2.f32 %v486_v54  ;;  %v650_v4 = vld [vmem:[#allocation3 + $0x70] sm:$0xff] }
 0x2c4   :  { %1323 = vpow2.f32 %v488_v3 }
 0x2c5   :  { %1142 = vst.msk [vmem:[%s2345_s6] sm:$0xff] %vm2579_vm4, %v1094_v45  ;;  %v909_v20 = vpop.xlane.xlu1 %908  ;;  %1325 = vpow2.f32 %v504_v7 }
 0x2c6   :  { %v927_v16 = vadd.f32 %v909_v20, %v863_v52  ;;  %1327 = vpow2.f32 %v484_v38  ;;  %v648_v20 = vld [vmem:[#allocation3 + $0x60] sm:$0xff] }
 0x2c7   :  { %1329 = vpow2.f32 %v500_v47 }
 0x2c8   :  { %943 = vst.msk [vmem:[#allocation4 + $0x68] sm:$0xff] %vm2580_vm9, %v927_v16  ;;  %1331 = vpow2.f32 %v502_v18 }
 0x2c9   :  { %v687_v57 = vpop.xlane.xlu1 %686 }
 0x2ca   :  { %v709_v32 = vadd.f32 %v687_v57, %v661_v22  ;;  %v649_v57 = vld [vmem:[#allocation3 + $0x68] sm:$0xff] }
 0x2cb   :  { %v1318_v39 = vpop.eup %1317 }
 0x2cc   :  { %v1001_v35 = vmul.f32 0.6931472, %v1318_v39  ;;  %726 = vst.msk [vmem:[#allocation3 + $0x48] sm:$0xff] %vm2581_vm11, %v709_v32  ;;  %v1320_v37 = vpop.eup %1319  ;;  %v864_v32 = vld [vmem:[#allocation4 + $0x70] sm:$0xff] }
 0x2cd   :  { %v683_v30 = vpop.xlane.xlu1 %682  ;;  %v667_v56 = vmul.f32 %v1320_v37, %v651_v25  ;;  %v1322_v17 = vpop.eup %1321  ;;  %v865_v37 = vld [vmem:[#allocation4 + $0x78] sm:$0xff] }
 0x2ce   :  { %v1031_v8 = vadd.f32 %v1001_v35, %v967_v27  ;;  %v707_v6 = vadd.f32 %v683_v30, %v659_v59  ;;  %v657_v42 = vmul.f32 %v1322_v17, %v641_v46  ;;  %v1324_v33 = vpop.eup %1323 }
 0x2cf   :  { %v658_v12 = vmul.f32 %v1324_v33, %v642_v11  ;;  %v1326_v23 = vpop.eup %1325 }
 0x2d0   :  { %v1095_v26 = vsub.f32 %v1031_v8, %v1079_v1  ;;  %724 = vst.msk [vmem:[#allocation3 + $0x38] sm:$0xff] %vm2582_vm15, %v707_v6  ;;  %v666_v19 = vmul.f32 %v1326_v23, %v650_v4  ;;  %v1328_v9 = vpop.eup %1327 }
 0x2d1   :  { %v699_v61 = vpop.xlane.xlu1 %698  ;;  %v656_v45 = vmul.f32 %v1328_v9, %v640_v34  ;;  %v1330_v52 = vpop.eup %1329 }
 0x2d2   :  { %1143 = vst.msk [vmem:[%s2345_s6 + $0x8] sm:$0xff] %vm2583_vm2, %v1095_v26  ;;  %v715_v40 = vadd.f32 %v699_v61, %v667_v56  ;;  %v664_v16 = vmul.f32 %v1330_v52, %v648_v20  ;;  %v1332_v22 = vpop.eup %1331 }
 0x2d3   :  { %v665_v39 = vmul.f32 %v1332_v22, %v649_v57 }
 0x2d4   :  { %732 = vst.msk [vmem:[#allocation3 + $0x78] sm:$0xff] %vm2584_vm13, %v715_v40 }
 0x2d5   :  { %v679_v43 = vpop.xlane.xlu1 %678 }
 0x2d6   :  { %v705_v2 = vadd.f32 %v679_v43, %v657_v42 }
 0x2d8   :  { %722 = vst.msk [vmem:[#allocation3 + $0x28] sm:$0xff] %vm2585_vm6, %v705_v2 }
 0x2f2   :  { %v903_v14 = vpop.xlane.xlu0 %902 }
 0x2f3   :  { %v924_v15 = vadd.f32 %v903_v14, %v860_v28 }
 0x2f5   :  { %940 = vst.msk [vmem:[#allocation4 + $0x50] sm:$0xff] %vm2594_vm12, %v924_v15 }
 0x2f6   :  { %v907_v21 = vpop.xlane.xlu0 %906 }
 0x2f7   :  { %v926_v41 = vadd.f32 %v907_v21, %v862_v48 }
 0x2f9   :  { %942 = vst.msk [vmem:[#allocation4 + $0x60] sm:$0xff] %vm2595_vm5, %v926_v41 }
 0x2fa   :  { %v681_v5 = vpop.xlane.xlu0 %680 }
 0x2fb   :  { %v706_v13 = vadd.f32 %v681_v5, %v658_v12 }
 0x2fd   :  { %723 = vst.msk [vmem:[#allocation3 + $0x30] sm:$0xff] %vm2563_vm0, %v706_v13 }
 0x2fe   :  { %v697_v50 = vpop.xlane.xlu0 %696 }
 0x2ff   :  { %v714_v54 = vadd.f32 %v697_v50, %v666_v19 }
 0x301   :  { %731 = vst.msk [vmem:[#allocation3 + $0x70] sm:$0xff] %vm2596_vm10, %v714_v54 }
 0x302   :  { %v677_v29 = vpop.xlane.xlu0 %676 }
 0x303   :  { %v704_v36 = vadd.f32 %v677_v29, %v656_v45 }
 0x305   :  { %721 = vst.msk [vmem:[#allocation3 + $0x20] sm:$0xff] %vm2597_vm7, %v704_v36 }
 0x306   :  { %v693_v51 = vpop.xlane.xlu0 %692 }
 0x307   :  { %v712_v53 = vadd.f32 %v693_v51, %v664_v16 }
 0x309   :  { %729 = vst.msk [vmem:[#allocation3 + $0x60] sm:$0xff] %vm2598_vm14, %v712_v53 }
 0x30a   :  { %v911_v55 = vpop.xlane.xlu0 %910  ;;  %v695_v58 = vpop.xlane.xlu1 %694 }
 0x30b   :  { %v928_v35 = vadd.f32 %v911_v55, %v864_v32  ;;  %v713_v59 = vadd.f32 %v695_v58, %v665_v39 }
 0x30d   :  { %944 = vst.msk [vmem:[#allocation4 + $0x70] sm:$0xff] %vm2599_vm3, %v928_v35 }
 0x30e   :  { %730 = vst.msk [vmem:[#allocation3 + $0x68] sm:$0xff] %vm2600_vm1, %v713_v59  ;;  %v913_v27 = vpop.xlane.xlu1 %912 }
 0x30f   :  { %v929_v30 = vadd.f32 %v913_v27, %v865_v37 }
 0x311   :  { %945 = vst.msk [vmem:[#allocation4 + $0x78] sm:$0xff] %vm2601_vm8, %v929_v30 }

</bundles_post_ra>
